<compile_context>
chip_gen: v7x
topology: tpu7x:2x2x1
jax: 0.10.0
libtpu: 0.0.40
codegen_flags: <defaults>
</compile_context>

<pallas_src>
import functools
import math

import jax
import jax.numpy as jnp
from jax.experimental import pallas as pl
from jax.experimental.pallas import tpu as pltpu

_TWO_PI = 2.0 * math.pi


def _pe_kernel(gx_ref, gy_ref, out_ref, *, h, w, chunk):
    # gx_ref, gy_ref: (F, 1) f32, already scaled by 2*pi.
    # out_ref: (2F, block_hw); rows [0,F) = sin, rows [F,2F) = cos.
    # NOTE: if F is not a multiple of 8 the cos store starts on an unaligned
    # sublane (still correct, just masked sublane stores -> slower).
    F = gx_ref.shape[0]
    block_hw = out_ref.shape[1]
    n_chunks = block_hw // chunk

    base = pl.program_id(0) * block_hw                       # flattened hw offset of block
    lane = jax.lax.broadcasted_iota(jnp.int32, (1, chunk), 1)  # hoisted out of the loop
    inv_w = 1.0 / w
    inv_h = 1.0 / h

    def body(c, carry):
        start = pl.multiple_of(c * chunk, chunk)
        p = base + start + lane                               # (1, chunk) flat index i*w + j
        pf = p.astype(jnp.float32)
        # row = p // w, col = p % w, without vector integer div/mod:
        # float estimate then +/-1 integer correction (exact for realistic hw).
        row = jnp.floor(pf * inv_w).astype(jnp.int32)
        row = jnp.where(row * w > p, row - 1, row)
        row = jnp.where((row + 1) * w <= p, row + 1, row)
        col = p - row * w
        # centered, normalized coords in [-1, 1]  (2 * ((idx + 0.5)/dim) - 1)
        xn = (col.astype(jnp.float32) + 0.5) * (2.0 * inv_w) - 1.0   # (1, chunk)
        yn = (row.astype(jnp.float32) + 0.5) * (2.0 * inv_h) - 1.0   # (1, chunk)
        # phase[f, p] = 2*pi * (g_x[f] * xn[p] + g_y[f] * yn[p])  (2*pi folded in g)
        phase = gx_ref[...] * xn + gy_ref[...] * yn                  # (F, chunk), VPU
        out_ref[0:F, pl.ds(start, chunk)] = jnp.sin(phase).astype(out_ref.dtype)
        out_ref[F:2 * F, pl.ds(start, chunk)] = jnp.cos(phase).astype(out_ref.dtype)
        return carry

    jax.lax.fori_loop(0, n_chunks, body, 0, unroll=True)


def _round_up(x, m):
    return ((x + m - 1) // m) * m


def _cdiv(a, b):
    return (a + b - 1) // b


@functools.partial(jax.jit, static_argnames=("size", "max_block_hw", "out_dtype"))
def position_embedding_random_forward(gaussian_matrix, size, max_block_hw=8192,
                                      out_dtype=jnp.float32):
    """gaussian_matrix: (2, num_pos_feats) f32.  size: (h, w).  Returns (2F, h, w)."""
    h, w = size
    F = gaussian_matrix.shape[1]
    hw = h * w

    # Spatial block (lane) sizing:
    #  - multiple of 128 (unmasked lane-dense stores except the ragged tail),
    #  - split so n_blocks >= 2 when possible (v7x megacore),
    #  - capped at max_block_hw (4 MiB f32 output tile at 2F=128, BLK=8192).
    if hw < 128:
        block_hw = hw          # block == full array dim (allowed), single block
        chunk = hw
    else:
        blk_cap = max(128, (max_block_hw // 128) * 128)
        block_hw = min(_round_up(_cdiv(hw, 2), 128), blk_cap)
        # In-kernel lane sub-tile: keep the (F, chunk) phase <= ~128 KiB so
        # phase/sin/cos fit the vreg file (no VMEM spill round-trip).
        chunk = 128
        for c in (512, 256):
            if block_hw % c == 0 and F * c * 4 <= (128 << 10):
                chunk = c
                break
    n_blocks = _cdiv(hw, block_hw)

    # Gaussian matrix as two (F, 1) columns with 2*pi pre-folded (cheap (F,1)
    # pre-scale, removes one full (F, chunk) multiply pass per chunk).
    gm = gaussian_matrix.astype(jnp.float32)
    gx = (_TWO_PI * gm[0, :]).reshape(F, 1)
    gy = (_TWO_PI * gm[1, :]).reshape(F, 1)

    kernel = functools.partial(_pe_kernel, h=h, w=w, chunk=chunk)

    itemsize = jnp.dtype(out_dtype).itemsize
    cost = pl.CostEstimate(
        flops=6 * F * hw,                 # broadcast mul-adds + coord affine
        transcendentals=2 * F * hw,       # sin + cos
        bytes_accessed=2 * F * hw * itemsize + 2 * F * 4,
    )

    out2d = pl.pallas_call(
        kernel,
        out_shape=jax.ShapeDtypeStruct((2 * F, hw), out_dtype),
        grid_spec=pltpu.PrefetchScalarGridSpec(
            num_scalar_prefetch=0,
            grid=(n_blocks,),
            in_specs=[
                pl.BlockSpec((F, 1), lambda i: (0, 0)),
                pl.BlockSpec((F, 1), lambda i: (0, 0)),
            ],
            out_specs=pl.BlockSpec((2 * F, block_hw), lambda i: (0, i)),
        ),
        compiler_params=pltpu.CompilerParams(
            dimension_semantics=("parallel",),
        ),
        cost_estimate=cost,
    )(gx, gy)

    # Free metadata reshape to channel-first (2F, h, w); no extra HBM pass.
    return out2d.reshape(2 * F, h, w)


# TODO(synk): forward_with_coords (arbitrary point prompts) is not kernelized;
# it is the same _pe_encoding math applied to a tiny (B, N, 2) coordinate tensor.


def _reference(gaussian_matrix, size):
    """Pure-JAX port of PositionEmbeddingRandom.forward for verification."""
    h, w = size
    grid = jnp.ones((h, w), jnp.float32)
    y_embed = (jnp.cumsum(grid, axis=0) - 0.5) / h
    x_embed = (jnp.cumsum(grid, axis=1) - 0.5) / w
    coords = jnp.stack([x_embed, y_embed], axis=-1)        # (h, w, 2)
    coords = 2.0 * coords - 1.0
    coords = coords @ gaussian_matrix                      # (h, w, F)
    coords = _TWO_PI * coords
    pe = jnp.concatenate([jnp.sin(coords), jnp.cos(coords)], axis=-1)
    return jnp.transpose(pe, (2, 0, 1))                    # (2F, h, w)


if __name__ == "__main__":
    num_pos_feats = 64
    scale = 1.0   # PyTorch default (scale=None -> 1.0)

    key = jax.random.PRNGKey(0)
    gaussian_matrix = scale * jax.random.normal(
        key, (2, num_pos_feats), jnp.float32)

    # Main case (power-of-two grid) + a ragged / non-power-of-two-width case
    # that exercises the masked final block and the row/col reconstruction.
    for size in ((16, 16), (9, 20)):
        pe = position_embedding_random_forward(gaussian_matrix, size)
        pe = jax.block_until_ready(pe)

        ref = _reference(gaussian_matrix, size)
        assert pe.shape == (2 * num_pos_feats, size[0], size[1]), pe.shape
        max_err = float(jnp.max(jnp.abs(pe - ref)))
        assert jnp.allclose(pe, ref, atol=1e-4, rtol=1e-4), (
            f"mismatch vs reference at size={size}, max_abs_err={max_err}")

    print("KERNEL_OK")
</pallas_src>

<mosaic_0001>
module attributes {stable_mosaic.version = 11 : i64} {
  func.func @_pe_kernel(%arg0: i32, %arg1: memref<64x1xf32, #tpu.memory_space<vmem>>, %arg2: memref<64x1xf32, #tpu.memory_space<vmem>>, %arg3: memref<128x128xf32, #tpu.memory_space<vmem>>) attributes {dimension_semantics = [#tpu.dimension_semantics<parallel>], iteration_bounds = array<i64: 2>, scalar_prefetch = 0 : i64, scratch_operands = 0 : i64, tpu.core_type = #tpu.core_type<tc>, window_params = [{pipeline_mode = #tpu.pipeline_mode<synchronous>, transform_indices = @transform_0, window_bounds = array<i64: 64, 1>}, {pipeline_mode = #tpu.pipeline_mode<synchronous>, transform_indices = @transform_1, window_bounds = array<i64: 64, 1>}, {transform_indices = @transform_2, window_bounds = array<i64: 128, 128>}]} {
    %c128_i32 = arith.constant 128 : i32
    %0 = arith.muli %arg0, %c128_i32 : i32
    %1 = tpu.iota {dimensions = array<i32: 1>} : vector<1x128xi32>
    %c0_i32 = arith.constant 0 : i32
    %c128_i32_0 = arith.constant 128 : i32
    %2 = arith.muli %c0_i32, %c128_i32_0 : i32
    %3 = tpu.assume_multiple %2, 128 : i32
    %4 = arith.addi %0, %3 : i32
    %5 = vector.broadcast %4 : i32 to vector<1x128xi32>
    %6 = arith.addi %5, %1 : vector<1x128xi32>
    %7 = arith.sitofp %6 : vector<1x128xi32> to vector<1x128xf32>
    %cst = arith.constant 6.250000e-02 : f32
    %8 = vector.broadcast %cst : f32 to vector<1x128xf32>
    %9 = arith.mulf %7, %8 : vector<1x128xf32>
    %10 = math.floor %9 : vector<1x128xf32>
    %11 = arith.fptosi %10 : vector<1x128xf32> to vector<1x128xi32>
    %c16_i32 = arith.constant 16 : i32
    %12 = vector.broadcast %c16_i32 : i32 to vector<1x128xi32>
    %13 = arith.muli %11, %12 : vector<1x128xi32>
    %14 = arith.cmpi sgt, %13, %6 : vector<1x128xi32>
    %c1_i32 = arith.constant 1 : i32
    %15 = vector.broadcast %c1_i32 : i32 to vector<1x128xi32>
    %16 = arith.subi %11, %15 : vector<1x128xi32>
    %17 = arith.select %14, %16, %11 : vector<1x128xi1>, vector<1x128xi32>
    %c1_i32_1 = arith.constant 1 : i32
    %18 = vector.broadcast %c1_i32_1 : i32 to vector<1x128xi32>
    %19 = arith.addi %17, %18 : vector<1x128xi32>
    %c16_i32_2 = arith.constant 16 : i32
    %20 = vector.broadcast %c16_i32_2 : i32 to vector<1x128xi32>
    %21 = arith.muli %19, %20 : vector<1x128xi32>
    %22 = arith.cmpi sle, %21, %6 : vector<1x128xi32>
    %c1_i32_3 = arith.constant 1 : i32
    %23 = vector.broadcast %c1_i32_3 : i32 to vector<1x128xi32>
    %24 = arith.addi %17, %23 : vector<1x128xi32>
    %25 = arith.select %22, %24, %17 : vector<1x128xi1>, vector<1x128xi32>
    %c16_i32_4 = arith.constant 16 : i32
    %26 = vector.broadcast %c16_i32_4 : i32 to vector<1x128xi32>
    %27 = arith.muli %25, %26 : vector<1x128xi32>
    %28 = arith.subi %6, %27 : vector<1x128xi32>
    %29 = arith.sitofp %28 : vector<1x128xi32> to vector<1x128xf32>
    %cst_5 = arith.constant 5.000000e-01 : f32
    %30 = vector.broadcast %cst_5 : f32 to vector<1x128xf32>
    %31 = arith.addf %29, %30 : vector<1x128xf32>
    %cst_6 = arith.constant 1.250000e-01 : f32
    %32 = vector.broadcast %cst_6 : f32 to vector<1x128xf32>
    %33 = arith.mulf %31, %32 : vector<1x128xf32>
    %cst_7 = arith.constant 1.000000e+00 : f32
    %34 = vector.broadcast %cst_7 : f32 to vector<1x128xf32>
    %35 = arith.subf %33, %34 : vector<1x128xf32>
    %36 = arith.sitofp %25 : vector<1x128xi32> to vector<1x128xf32>
    %cst_8 = arith.constant 5.000000e-01 : f32
    %37 = vector.broadcast %cst_8 : f32 to vector<1x128xf32>
    %38 = arith.addf %36, %37 : vector<1x128xf32>
    %cst_9 = arith.constant 1.250000e-01 : f32
    %39 = vector.broadcast %cst_9 : f32 to vector<1x128xf32>
    %40 = arith.mulf %38, %39 : vector<1x128xf32>
    %cst_10 = arith.constant 1.000000e+00 : f32
    %41 = vector.broadcast %cst_10 : f32 to vector<1x128xf32>
    %42 = arith.subf %40, %41 : vector<1x128xf32>
    %c0 = arith.constant 0 : index
    %c0_11 = arith.constant 0 : index
    %43 = vector.load %arg1[%c0, %c0_11] : memref<64x1xf32, #tpu.memory_space<vmem>>, vector<64x1xf32>
    %44 = vector.broadcast %43 : vector<64x1xf32> to vector<64x128xf32>
    %45 = vector.broadcast %35 : vector<1x128xf32> to vector<64x128xf32>
    %46 = arith.mulf %44, %45 : vector<64x128xf32>
    %c0_12 = arith.constant 0 : index
    %c0_13 = arith.constant 0 : index
    %47 = vector.load %arg2[%c0_12, %c0_13] : memref<64x1xf32, #tpu.memory_space<vmem>>, vector<64x1xf32>
    %48 = vector.broadcast %47 : vector<64x1xf32> to vector<64x128xf32>
    %49 = vector.broadcast %42 : vector<1x128xf32> to vector<64x128xf32>
    %50 = arith.mulf %48, %49 : vector<64x128xf32>
    %51 = arith.addf %46, %50 : vector<64x128xf32>
    %52 = math.sin %51 : vector<64x128xf32>
    %c0_14 = arith.constant 0 : index
    %53 = arith.index_cast %3 : i32 to index
    %54 = vector.load %arg3[%c0_14, %53] : memref<128x128xf32, #tpu.memory_space<vmem>>, vector<64x128xf32>
    tpu.vector_store %arg3[%c0_14, %53], %52 {strides = array<i32>} : memref<128x128xf32, #tpu.memory_space<vmem>>, vector<64x128xf32>,
    %55 = math.cos %51 : vector<64x128xf32>
    %c64 = arith.constant 64 : index
    %56 = arith.index_cast %3 : i32 to index
    %57 = vector.load %arg3[%c64, %56] : memref<128x128xf32, #tpu.memory_space<vmem>>, vector<64x128xf32>
    tpu.vector_store %arg3[%c64, %56], %55 {strides = array<i32>} : memref<128x128xf32, #tpu.memory_space<vmem>>, vector<64x128xf32>,
    %c1_i32_15 = arith.constant 1 : i32
    return
  }
  func.func @transform_0(%arg0: i32) -> (i32, i32) {
    %c0_i32 = arith.constant 0 : i32
    %c0_i32_0 = arith.constant 0 : i32
    %c0_i32_1 = arith.constant 0 : i32
    return %c0_i32, %c0_i32_0 : i32, i32
  }
  func.func @transform_1(%arg0: i32) -> (i32, i32) {
    %c0_i32 = arith.constant 0 : i32
    %c0_i32_0 = arith.constant 0 : i32
    %c0_i32_1 = arith.constant 0 : i32
    return %c0_i32, %c0_i32_0 : i32, i32
  }
  func.func @transform_2(%arg0: i32) -> (i32, i32) {
    %c0_i32 = arith.constant 0 : i32
    %c0_i32_0 = arith.constant 0 : i32
    return %c0_i32, %arg0 : i32, i32
  }
}

</mosaic_0001>

<bundles_post_ra>
// kernel: position_embedding_random_forward.1
= control target key start
LH: loop header
LB: loop body
LE: loop exit
PB: predicated region body
PF: predicated region fallthrough
CT: control target
= control target key end

     0   :  { %s2299_s9 = smov 0   ;;  %s2301_s10 = smov 0   ;;  %s3165_s0 = inlined_call_operand.vmem [shape: f32[64,1], index: 0, kind: input, shape index: {}]   ;;  %s3166_s1 = inlined_call_operand.vmem [shape: f32[64,1], index: 1, kind: input, shape index: {}]   ;;  %s3167_s2 = inlined_call_operand.vmem [shape: f32[128,256], index: 2, kind: output, shape index: {}]  }
   0x1   :  { %s2303_s11 = smov 0  }
   0x2 LB: > { %s2312_s12 = sadd.s32 4294967295, %s2275_s11   ;;  %s2314_s13 = sadd.s32 1, %s2275_s11   ;;  %s2275_s11 = sphi %s2303_s11, %s3183_s11   ;;  %s2271_s10 = sphi %s2301_s10, %s3182_s10   ;;  %s2267_s9 = sphi %s2299_s9, %s3181_s9  }
   0x3   : > { %s58_s14 = ssub.s32 %s2275_s11, %s2314_s13  ;;  %s61_s15 = sadd.s32 1, %s2271_s10 }
   0x4   : > { %p59_p0 = scmp.eq.s32.totalorder %s58_s14, 0  ;;  %p71_p1 = scmp.ne.s32.totalorder %s2271_s10, %s2267_s9 }
   0x5   : > { %p72_p2 = scmp.eq.s32.totalorder %s2312_s12, 1  ;;  %p2080_p3 = scmp.ge.s32.totalorder %s2275_s11, 1 }
   0x6   : > { %s2322_s16 = scalar_select %p59_p0, %s2271_s10, %s61_s15  }
   0x7   : > { %p2324_p4 = por %p72_p2, %p71_p1  ;;  %p102_p5 = scmp.lt.s32.totalorder %s2275_s11, 3 }
   0x9   : > { %p103_p6 = pnand %p2080_p3, %p102_p5 }
   0xa   : > { %v148_v0 = vld [vmem:[%s3165_s0 + $0x10] sm:$0xff] (!%p103_p6)  ;;  %v146_v1 = vld [vmem:[%s3165_s0] sm:$0xff] (!%p103_p6)  ;;  %v2277_v2 = vmov (!%p103_p6), 0   ;;  %v149_v3 = vld [vmem:[%s3165_s0 + $0x18] sm:$0xff] (!%p103_p6)  ;;  %v119_v17 = vlaneseq (!%p103_p6)  ;;  %s2082_s28 = sshll.u32 (!%p103_p6), %s2312_s12, 7  ;;  %s115_s29 = sand.u32 (!%p103_p6), 1, %s2267_s9  }
   0xb   : > { %106 = sbr.rel (%p103_p6) target bundleno = 417 (0x1a1), region = 28  ;;  %2220 = vset.pattern.permute.xlu1 (!%p103_p6), %v2277_v2  ;;  %2219 = vset.pattern.permute.xlu0 (!%p103_p6), %v2277_v2  ;;  %v147_v4 = vld [vmem:[%s3165_s0 + $0x8] sm:$0xff] (!%p103_p6)  ;;  %v150_v6 = vld [vmem:[%s3165_s0 + $0x20] sm:$0xff] (!%p103_p6)  ;;  %v153_v7 = vld [vmem:[%s3165_s0 + $0x38] sm:$0xff] (!%p103_p6)  ;;  %v122_v19 = vstv (!%p103_p6), %s2082_s28  ;;  %s2638_s9 = sshll.u32 (!%p103_p6), %s115_s29, 7 }
   0xc   : > { %166 = vperm.xlu1 (!%p103_p6), %2220, %v148_v0   ;;  %156 = vperm.xlu0 (!%p103_p6), %2219, %v146_v1   ;;  %v151_v5 = vld [vmem:[%s3165_s0 + $0x28] sm:$0xff] (!%p103_p6)  ;;  %v152_v8 = vld [vmem:[%s3165_s0 + $0x30] sm:$0xff] (!%p103_p6)  ;;  %v202_v10 = vld [vmem:[%s3166_s1] sm:$0xff] (!%p103_p6)  ;;  %v120_v18 = vand.u32 (!%p103_p6), 127, %v119_v17  ;;  %s2673_s30 = scalar_lea.vmem (!%p103_p6), [#allocation2], %s2638_s9 }
   0xd   : > { %v203_v9 = vld [vmem:[%s3166_s1 + $0x8] sm:$0xff] (!%p103_p6)  ;;  %v205_v11 = vld [vmem:[%s3166_s1 + $0x18] sm:$0xff] (!%p103_p6)  ;;  %v204_v12 = vld [vmem:[%s3166_s1 + $0x10] sm:$0xff] (!%p103_p6) }
   0xe   : > { %v207_v13 = vld [vmem:[%s3166_s1 + $0x28] sm:$0xff] (!%p103_p6)  ;;  %v206_v14 = vld [vmem:[%s3166_s1 + $0x20] sm:$0xff] (!%p103_p6)  ;;  %v209_v15 = vld [vmem:[%s3166_s1 + $0x38] sm:$0xff] (!%p103_p6)  ;;  %v123_v20 = vadd.s32 (!%p103_p6), %v122_v19, %v120_v18 }
   0xf   : > { %v208_v16 = vld [vmem:[%s3166_s1 + $0x30] sm:$0xff] (!%p103_p6) }
  0x10   : > { %171 = vperm.xlu1 (!%p103_p6), %2220, %v149_v3   ;;  %161 = vperm.xlu0 (!%p103_p6), %2219, %v147_v4   ;;  %v124_v21 = vcvt.s32.f32 (!%p103_p6), %v123_v20 }
  0x12   : > { %v125_v22 = vmul.f32 0.0625, %v124_v21  ;;  %s2151_s3 = sshll.u32 (%p2324_p4), %s2312_s12, 3 }
  0x13   : > { %s1946_s6 = scalar_lea.vmem (%p2324_p4), %s3167_s2, %s2151_s3 }
  0x14   : > { %181 = vperm.xlu1 %2220, %v151_v5   ;;  %176 = vperm.xlu0 %2219, %v150_v6   ;;  %v126_v23 = vfloor.f32 %v125_v22 }
  0x16   : > { %v2154_v24 = vtrunc.f32 %v126_v23 }
  0x18   : > { %191 = vperm.xlu1 %2220, %v153_v7   ;;  %186 = vperm.xlu0 %2219, %v152_v8   ;;  %v2155_v25 = vcvt.f32.s32 %v2154_v24 }
  0x1a   : > { %v128_v26 = vmul.u32 16, %v2155_v25  ;;  %v2083_v27 = vadd.s32 4294967295, %v2155_v25 }
  0x1c   : > { %217 = vperm.xlu1 %2220, %v203_v9   ;;  %212 = vperm.xlu0 %2219, %v202_v10   ;;  %vm129_vm0 = vcmp.gt.s32.totalorder %v128_v26, %v123_v20 }
  0x1d   : > { %v131_v28 = vsel %vm129_vm0, %v2083_v27, %v2155_v25 }
  0x1e   : > { %v132_v29 = vadd.s32 1, %v131_v28 }
  0x20   : > { %227 = vperm.xlu1 %2220, %v205_v11   ;;  %222 = vperm.xlu0 %2219, %v204_v12   ;;  %v133_v30 = vmul.u32 16, %v132_v29 }
  0x22   : > { %vm134_vm1 = vcmp.le.s32.totalorder %v133_v30, %v123_v20 }
  0x23   : > { %v135_v31 = vsel %vm134_vm1, %v132_v29, %v131_v28  ;;  %v2278_v28 = vmov 683565275  }
  0x24   : > { %237 = vperm.xlu1 %2220, %v207_v13   ;;  %232 = vperm.xlu0 %2219, %v206_v14   ;;  %v136_v32 = vmul.u32 16, %v135_v31  ;;  %v142_v41 = vcvt.s32.f32 %v135_v31 }
  0x26   : > { %v137_v33 = vsub.s32 %v123_v20, %v136_v32  ;;  %v143_v44 = vadd.f32 0.5, %v142_v41  ;;  %v2279_v32 = vmov 2475754826  }
  0x28   : > { %247 = vperm.xlu1 %2220, %v209_v15   ;;  %242 = vperm.xlu0 %2219, %v208_v16   ;;  %v138_v34 = vcvt.s32.f32 %v137_v33  ;;  %v144_v49 = vmul.f32 0.125, %v143_v44 }
  0x2a   : > { %v139_v35 = vadd.f32 0.5, %v138_v34  ;;  %v2387_v54 = vadd.f32 -1.0, %v144_v49  ;;  %v2280_v34 = vmov 2131351028  }
  0x2c   : > { %v140_v36 = vmul.f32 0.125, %v139_v35 }
  0x2e   : > { %v2084_v37 = vadd.f32 -1.0, %v140_v36  ;;  %v2281_v36 = vmov 2102212464  }
  0x8b   : > { %v167_v38 = vpop.permute.xlu1 %166  ;;  %v157_v39 = vpop.permute.xlu0 %156 }
  0x8c   : > { %v2377_v40 = vmul.f32 %v2084_v37, %v167_v38  ;;  %v194_v57 = vmul.f32 %v2084_v37, %v157_v39  ;;  %v2282_v38 = vmov 920167782  }
  0x8f   : > { %v172_v42 = vpop.permute.xlu1 %171  ;;  %v162_v43 = vpop.permute.xlu0 %161 }
  0x90   : > { %v195_v58 = vmul.f32 %v2084_v37, %v162_v43  ;;  %v197_v4 = vmul.f32 %v2084_v37, %v172_v42 }
  0x93   : > { %v182_v45 = vpop.permute.xlu1 %181  ;;  %v177_v46 = vpop.permute.xlu0 %176 }
  0x94   : > { %v2379_v47 = vmul.f32 %v2084_v37, %v182_v45  ;;  %v2381_v48 = vmul.f32 %v2084_v37, %v177_v46  ;;  %v2283_v46 = vmov 1326507024  }
  0x97   : > { %v192_v50 = vpop.permute.xlu1 %191  ;;  %v187_v51 = vpop.permute.xlu0 %186 }
  0x98   : > { %v2383_v52 = vmul.f32 %v2084_v37, %v192_v50  ;;  %v2385_v53 = vmul.f32 %v2084_v37, %v187_v51 }
  0x9b   : > { %v218_v55 = vpop.permute.xlu1 %217  ;;  %v213_v56 = vpop.permute.xlu0 %212 }
  0x9c   : > { %v251_v59 = vmul.f32 %v2387_v54, %v218_v55  ;;  %v250_v60 = vmul.f32 %v2387_v54, %v213_v56 }
  0x9e   : > { %v2391_v61 = vadd.f32 %v251_v59, %v195_v58  ;;  %v2393_v62 = vadd.f32 %v250_v60, %v194_v57 }
  0x9f   : > { %v228_v63 = vpop.permute.xlu1 %227 }
  0xa0   : > { %v370_v0 = vand.u32 2147483647, %v2391_v61  ;;  %v373_v1 = vand.u32 2139095040, %v2391_v61  ;;  %v266_v2 = vand.u32 2147483647, %v2393_v62  ;;  %v269_v3 = vand.u32 2139095040, %v2393_v62 }
  0xa1   : > { %v253_v6 = vmul.f32 %v2387_v54, %v228_v63  ;;  %vm372_vm15 = vcmp.lt.s32.totalorder %v2391_v61, 0 }
  0xa2   : > { %v374_v5 = vshrl.u32 %v373_v1, 23  ;;  %v377_v7 = vand.u32 8388607, %v370_v0  ;;  %v270_v8 = vshrl.u32 %v269_v3, 23  ;;  %v273_v9 = vand.u32 8388607, %v266_v2 }
  0xa3   : > { %v2404_v11 = vadd.f32 %v253_v6, %v197_v4  ;;  %vm2491_vm0 = vcmp.le.f32.partialorder %v370_v0, 0.7853982 }
  0xa4   : > { %v2090_v10 = vadd.s32 4294967169, %v374_v5  ;;  %v2086_v12 = vadd.s32 4294967169, %v270_v8  ;;  %v378_v14 = vor.u32 8388608, %v377_v7  ;;  %v274_v15 = vor.u32 8388608, %v273_v9 }
  0xa5   : > { %v581_v17 = vand.u32 2139095040, %v2404_v11  ;;  %v578_v26 = vand.u32 2147483647, %v2404_v11 }
  0xa6   : > { %v380_v13 = vadd.s32 1, %v2090_v10  ;;  %v276_v16 = vadd.s32 1, %v2086_v12  ;;  %v2407_v23 = vshll.u32 %v378_v14, 8  ;;  %v2411_v25 = vshll.u32 %v274_v15, 8 }
  0xa7   : > { %v582_v19 = vshrl.u32 %v581_v17, 23 }
  0xa8   : > { %vm381_vm2 = vcmp.gt.s32.totalorder %v380_v13, 0  ;;  %vm277_vm3 = vcmp.gt.s32.totalorder %v276_v16, 0 }
  0xa9   : > { %v382_v18 = vsel %vm381_vm2, %v380_v13, 0  ;;  %v278_v22 = vsel %vm277_vm3, %v276_v16, 0  ;;  %v2415_v31 = vadd.s32 4294967169, %v582_v19  ;;  %vm268_vm2 = vcmp.lt.s32.totalorder %v2393_v62, 0 }
  0xaa   : > { %v383_v20 = vshrl.u32 %v382_v18, 5  ;;  %v384_v21 = vand.u32 31, %v382_v18  ;;  %v2409_v24 = vshrl.u32 %v278_v22, 5  ;;  %v280_v30 = vand.u32 31, %v278_v22 }
  0xac   : > { %v385_v27 = vsub.s32 32, %v384_v21  ;;  %v387_v29 = vshll.u32 %v2278_v28, %v384_v21  ;;  %v390_v33 = vshll.u32 %v2279_v32, %v384_v21  ;;  %v393_v35 = vshll.u32 %v2280_v34, %v384_v21 }
  0xad   : > { %v396_v37 = vshll.u32 %v2281_v36, %v384_v21  ;;  %v399_v39 = vshll.u32 %v2282_v38, %v384_v21  ;;  %vm402_vm4 = vcmp.lt.s32.totalorder %v383_v20, 1  ;;  %vm403_vm5 = vcmp.lt.s32.totalorder %v383_v20, 2 }
  0xae   : > { %v388_v41 = vshrl.u32 %v2279_v32, %v385_v27  ;;  %v391_v42 = vshrl.u32 %v2280_v34, %v385_v27  ;;  %v394_v43 = vshrl.u32 %v2281_v36, %v385_v27  ;;  %v386_v44 = vshrl.u32 %v2278_v28, %v385_v27 }
  0xaf   : > { %v397_v45 = vshrl.u32 %v2282_v38, %v385_v27  ;;  %v400_v49 = vshrl.u32 %v2283_v46, %v385_v27  ;;  %v281_v56 = vsub.s32 32, %v280_v30  ;;  %vm404_vm6 = vcmp.lt.s32.totalorder %v383_v20, 3 }
  0xb0   : > { %v389_v50 = vor.u32 %v388_v41, %v387_v29  ;;  %v392_v51 = vor.u32 %v391_v42, %v390_v33  ;;  %v395_v55 = vor.u32 %v394_v43, %v393_v35  ;;  %vm405_vm7 = vcmp.lt.s32.totalorder %v383_v20, 4 }
  0xb1   : > { %v398_v57 = vor.u32 %v397_v45, %v396_v37  ;;  %v401_v58 = vor.u32 %v400_v49, %v399_v39  ;;  %v283_v6 = vshll.u32 %v2278_v28, %v280_v30  ;;  %v284_v9 = vshrl.u32 %v2279_v32, %v281_v56 }
  0xb2   : > { %v406_v59 = vsel %vm402_vm4, %v386_v44, %v389_v50  ;;  %v407_v60 = vsel %vm405_vm7, %v395_v55, 2102212464  ;;  %v410_v63 = vsel %vm402_vm4, %v389_v50, %v392_v51  ;;  %v414_v1 = vsel %vm402_vm4, %v392_v51, %v395_v55 }
  0xb3   : > { %v408_v3 = vsel %vm404_vm6, %v392_v51, %v407_v60  ;;  %v411_v4 = vsel %vm405_vm7, %v398_v57, 920167782  ;;  %v415_v5 = vsel %vm405_vm7, %v401_v58, 1326507024  ;;  %v286_v10 = vshll.u32 %v2279_v32, %v280_v30 }
  0xb4   : > { %v412_v7 = vsel %vm404_vm6, %v395_v55, %v411_v4  ;;  %v416_v8 = vsel %vm404_vm6, %v398_v57, %v415_v5  ;;  %v409_v12 = vsel %vm403_vm5, %v406_v59, %v408_v3  ;;  %v287_v15 = vshrl.u32 %v2280_v34, %v281_v56  ;;  %v223_v59 = vpop.permute.xlu0 %222 }
  0xb5   : > { %v413_v13 = vsel %vm403_vm5, %v410_v63, %v412_v7  ;;  %v417_v14 = vsel %vm403_vm5, %v414_v1, %v416_v8  ;;  %v285_v21 = vor.u32 %v284_v9, %v283_v6  ;;  %v289_v27 = vshll.u32 %v2280_v34, %v280_v30 }
  0xb6   : > { %v2438_v16 = vmul.u32.u64.low %v2407_v23, %v417_v14  ;;  %v2439_v17 = vmul.u32.u64.high %v2407_v23, %v417_v14, %v2438_v16  ;;  %v2442_v18 = vmul.u32.u64.low %v2407_v23, %v413_v13  ;;  %v2443_v19 = vmul.u32.u64.high %v2407_v23, %v413_v13, %v2442_v18 }
  0xb7   : > { %v288_v22 = vor.u32 %v287_v15, %v286_v10  ;;  %v290_v29 = vshrl.u32 %v2281_v36, %v281_v56  ;;  %v282_v20 = vshrl.u32 %v2278_v28, %v281_v56  ;;  %v292_v33 = vshll.u32 %v2281_v36, %v280_v30 }
  0xb8   : > { %v293_v35 = vshrl.u32 %v2282_v38, %v281_v56  ;;  %v296_v37 = vshrl.u32 %v2283_v46, %v281_v56  ;;  %v425_v39 = vmul.u32 %v2407_v23, %v409_v12  ;;  %v295_v42 = vshll.u32 %v2282_v38, %v280_v30 }
  0xb9   : > { %v291_v41 = vor.u32 %v290_v29, %v289_v27  ;;  %vm298_vm8 = vcmp.lt.s32.totalorder %v2409_v24, 1  ;;  %vm427_vm9 = vc.u32 %v2439_v17, %v2442_v18  ;;  %v428_v43 = vadd.s32 1, %v2443_v19 }
  0xba   : > { %v294_v44 = vor.u32 %v293_v35, %v292_v33  ;;  %vm299_vm10 = vcmp.lt.s32.totalorder %v2409_v24, 2  ;;  %v297_v45 = vor.u32 %v296_v37, %v295_v42  ;;  %vm300_vm11 = vcmp.lt.s32.totalorder %v2409_v24, 3  ;;  %v238_v35 = vpop.permute.xlu1 %237 }
  0xbb   : > { %vm301_vm12 = vcmp.lt.s32.totalorder %v2409_v24, 4  ;;  %v306_v49 = vsel %vm298_vm8, %v285_v21, %v288_v22  ;;  %v429_v23 = vsel %vm427_vm9, %v428_v43, %v2443_v19  ;;  %v310_v51 = vsel %vm298_vm8, %v288_v22, %v291_v41 }
  0xbc   : > { %v303_v50 = vsel %vm301_vm12, %v291_v41, 2102212464  ;;  %v307_v30 = vsel %vm301_vm12, %v294_v44, 920167782  ;;  %v430_v55 = vadd.s32 %v429_v23, %v425_v39  ;;  %v302_v56 = vsel %vm298_vm8, %v282_v20, %v285_v21 }
  0xbd   : > { %v308_v57 = vsel %vm300_vm11, %v291_v41, %v307_v30  ;;  %v311_v58 = vsel %vm301_vm12, %v297_v45, 1326507024  ;;  %v304_v60 = vsel %vm300_vm11, %v288_v22, %v303_v50  ;;  %v588_v3 = vadd.s32 1, %v2415_v31 }
  0xbe   : > { %v309_v63 = vsel %vm299_vm10, %v306_v49, %v308_v57  ;;  %v312_v1 = vsel %vm300_vm11, %v294_v44, %v311_v58  ;;  %v431_v4 = vadd.s32 536870912, %v430_v55  ;;  %v252_v10 = vmul.f32 %v2387_v54, %v223_v59 }
  0xbf   : > { %v313_v5 = vsel %vm299_vm10, %v310_v51, %v312_v1  ;;  %v2468_v6 = vmul.u32.u64.low %v2411_v25, %v309_v63  ;;  %v2469_v7 = vmul.u32.u64.high %v2411_v25, %v309_v63, %v2468_v6  ;;  %vm589_vm13 = vcmp.gt.s32.totalorder %v588_v3, 0 }
  0xc0   : > { %v2472_v8 = vmul.u32.u64.low %v2411_v25, %v313_v5  ;;  %v2473_v9 = vmul.u32.u64.high %v2411_v25, %v313_v5, %v2472_v8  ;;  %v432_v12 = vshrl.u32 %v431_v4, 30  ;;  %v305_v13 = vsel %vm299_vm10, %v302_v56, %v304_v60 }
  0xc1   : > { %v590_v31 = vsel %vm589_vm13, %v588_v3, 0  ;;  %v324_v15 = vadd.s32 1, %v2469_v7  ;;  %v585_v16 = vand.u32 8388607, %v578_v26  ;;  %v321_v19 = vmul.u32 %v2411_v25, %v305_v13 }
  0xc2   : > { %v433_v14 = vshll.u32 %v432_v12, 30  ;;  %vm323_vm14 = vc.u32 %v2473_v9, %v2468_v6  ;;  %v2484_v21 = vadd.f32 %v252_v10, %v2377_v40  ;;  %v592_v29 = vand.u32 31, %v590_v31 }
  0xc3   : > { %v325_v27 = vsel %vm323_vm14, %v324_v15, %v2469_v7  ;;  %v586_v33 = vor.u32 8388608, %v585_v16  ;;  %v456_v37 = vsub.s32 4, %v432_v12  ;;  %v2499_v45 = vmul.f32 %v2387_v54, %v238_v35 }
  0xc4   : > { %v434_v22 = vsub.s32 %v430_v55, %v433_v14  ;;  %v326_v24 = vadd.s32 %v325_v27, %v321_v19  ;;  %v477_v41 = vand.u32 2139095040, %v2484_v21  ;;  %v593_v42 = vsub.s32 32, %v592_v29 }
  0xc5   : > { %v474_v44 = vand.u32 2147483647, %v2484_v21  ;;  %v426_v49 = vadd.s32 %v2442_v18, %v2439_v17  ;;  %v2503_v50 = vshrl.u32 %v590_v31, 5  ;;  %v2505_v30 = vshll.u32 %v586_v33, 8 }
  0xc6   : > { %v436_v20 = vsub.s32 0, %v434_v22  ;;  %v327_v39 = vadd.s32 536870912, %v326_v24  ;;  %v457_v0 = vsel %vm372_vm15, %v456_v37, %v432_v12  ;;  %v2510_v51 = vadd.s32 %v2468_v6, %v2473_v9 }
  0xc7   : > { %v478_v56 = vshrl.u32 %v477_v41, 23  ;;  %v595_v58 = vshll.u32 %v2278_v28, %v592_v29  ;;  %v596_v59 = vshrl.u32 %v2279_v32, %v593_v42  ;;  %v599_v17 = vshrl.u32 %v2280_v34, %v593_v42 }
  0xc8   : > { %v2091_v25 = vmin.u32 %v436_v20, %v434_v22  ;;  %v2495_v43 = vshrl.u32 %v327_v39, 30  ;;  %v598_v60 = vshll.u32 %v2279_v32, %v592_v29  ;;  %v602_v63 = vshrl.u32 %v2281_v36, %v593_v42 }
  0xc9   : > { %v605_v1 = vshrl.u32 %v2282_v38, %v593_v42  ;;  %v2523_v3 = vsel %vm2491_vm0, 0, %v457_v0  ;;  %v594_v4 = vshrl.u32 %v2278_v28, %v593_v42  ;;  %v601_v5 = vshll.u32 %v2280_v34, %v592_v29 }
  0xca   : > { %v438_v23 = vclz %v2091_v25  ;;  %v329_v55 = vshll.u32 %v2495_v43, 30  ;;  %v604_v8 = vshll.u32 %v2281_v36, %v592_v29  ;;  %v608_v9 = vshrl.u32 %v2283_v46, %v593_v42 }
  0xcb   : > { %v597_v13 = vor.u32 %v596_v59, %v595_v58  ;;  %v600_v31 = vor.u32 %v599_v17, %v598_v60  ;;  %v603_v15 = vor.u32 %v602_v63, %v601_v5  ;;  %v607_v19 = vshll.u32 %v2282_v38, %v592_v29 }
  0xcc   : > { %v2092_v57 = vadd.s32 4294967294, %v438_v23  ;;  %v2516_v18 = vsub.s32 %v326_v24, %v329_v55  ;;  %v606_v16 = vor.u32 %v605_v1, %v604_v8  ;;  %v352_v33 = vsub.s32 4, %v2495_v43 }
  0xcd   : > { %v609_v37 = vor.u32 %v608_v9, %v607_v19  ;;  %vm610_vm3 = vcmp.lt.s32.totalorder %v2503_v50, 1  ;;  %vm611_vm4 = vcmp.lt.s32.totalorder %v2503_v50, 2  ;;  %vm613_vm5 = vcmp.lt.s32.totalorder %v2503_v50, 4 }
  0xce   : > { %vm2093_vm1 = vcmp.lt.s32.totalorder %v2092_v57, 0  ;;  %v332_v7 = vsub.s32 0, %v2516_v18  ;;  %v618_v25 = vsel %vm610_vm3, %v597_v13, %v600_v31  ;;  %vm612_vm6 = vcmp.lt.s32.totalorder %v2503_v50, 3 }
  0xcf   : > { %v441_v6 = vsel %vm2093_vm1, 0, %v2092_v57  ;;  %v619_v29 = vsel %vm613_vm5, %v606_v16, 920167782  ;;  %vm2540_vm7 = vcmp.le.f32.partialorder %v266_v2, 0.7853982  ;;  %v622_v57 = vsel %vm610_vm3, %v600_v31, %v603_v15 }
  0xd0   : > { %v442_v10 = vsub.s32 32, %v441_v6  ;;  %v446_v12 = vsub.s32 4294967266, %v441_v6  ;;  %v2087_v14 = vmin.u32 %v332_v7, %v2516_v18  ;;  %v443_v27 = vshll.u32 %v434_v22, %v441_v6 }
  0xd1   : > { %v614_v22 = vsel %vm610_vm3, %v594_v4, %v597_v13  ;;  %v615_v0 = vsel %vm613_vm5, %v603_v15, 2102212464  ;;  %v620_v55 = vsel %vm612_vm6, %v603_v15, %v619_v29  ;;  %v623_v17 = vsel %vm613_vm5, %v609_v37, 1326507024 }
  0xd2   : > { %v444_v24 = vshrl.u32 %v426_v49, %v442_v10  ;;  %v447_v20 = vadd.s32 127, %v446_v12  ;;  %v334_v35 = vclz %v2087_v14  ;;  %v621_v59 = vsel %vm611_vm4, %v618_v25, %v620_v55 }
  0xd3   : > { %v624_v1 = vsel %vm612_vm6, %v606_v16, %v623_v17  ;;  %v2094_v2 = vadd.s32 4294967169, %v478_v56  ;;  %v616_v6 = vsel %vm612_vm6, %v600_v31, %v615_v0  ;;  %v463_v31 = vadd.s32 3, %v2523_v3 }
  0xd4   : > { %v445_v39 = vor.u32 %v444_v24, %v443_v27  ;;  %v448_v41 = vshll.u32 %v447_v20, 23  ;;  %v2088_v42 = vadd.s32 4294967294, %v334_v35  ;;  %v625_v7 = vsel %vm611_vm4, %v622_v57, %v624_v1 }
  0xd5   : > { %v2556_v10 = vmul.u32.u64.low %v2505_v30, %v625_v7  ;;  %v2557_v12 = vmul.u32.u64.high %v2505_v30, %v625_v7, %v2556_v10  ;;  %v2561_v56 = vmul.u32.u64.low %v2505_v30, %v621_v59  ;;  %v2562_v15 = vmul.u32.u64.high %v2505_v30, %v621_v59, %v2561_v56 }
  0xd6   : > { %v449_v49 = vor.u32 4788187, %v448_v41  ;;  %v452_v58 = vcvt.s32.f32 %v445_v39  ;;  %vm2089_vm8 = vcmp.lt.s32.totalorder %v2088_v42, 0  ;;  %v353_v19 = vsel %vm268_vm2, %v352_v33, %v2495_v43 }
  0xd7   : > { %v337_v63 = vsel %vm2089_vm8, 0, %v2088_v42  ;;  %v484_v27 = vadd.s32 1, %v2094_v2  ;;  %v617_v20 = vsel %vm611_vm4, %v614_v22, %v616_v6  ;;  %v2575_v37 = vand.u32 3, %v2523_v3 }
  0xd8   : > { %v450_v60 = vand.u32 2147483647, %v449_v49  ;;  %v338_v4 = vsub.s32 32, %v337_v63  ;;  %v342_v5 = vsub.s32 4294967266, %v337_v63  ;;  %v339_v9 = vshll.u32 %v2516_v18, %v337_v63  ;;  %v233_v49 = vpop.permute.xlu0 %232 }
  0xd9   : > { %vm635_vm9 = vc.u32 %v2557_v12, %v2561_v56  ;;  %vm485_vm10 = vcmp.gt.s32.totalorder %v484_v27, 0  ;;  %v355_v50 = vsel %vm2540_vm7, 0, %v353_v19  ;;  %v636_v39 = vadd.s32 1, %v2562_v15 }
  0xda   : > { %v453_v8 = vmul.f32 %v452_v58, %v450_v60  ;;  %v340_v13 = vshrl.u32 %v2510_v51, %v338_v4  ;;  %v343_v14 = vadd.s32 127, %v342_v5  ;;  %v481_v51 = vand.u32 8388607, %v474_v44 }
  0xdb   : > { %v2584_v41 = vand.u32 3, %v463_v31  ;;  %v633_v25 = vmul.u32 %v2505_v30, %v617_v20  ;;  %v486_v3 = vsel %vm485_vm10, %v484_v27, 0  ;;  %v637_v29 = vsel %vm635_vm9, %v636_v39, %v2562_v15 }
  0xdc   : > { %v454_v16 = vxor.u32 2147483648, %v453_v8  ;;  %v341_v18 = vor.u32 %v340_v13, %v339_v9  ;;  %v344_v24 = vshll.u32 %v343_v14, 23  ;;  %v359_v40 = vadd.s32 3, %v355_v50 }
  0xdd   : > { %v638_v0 = vadd.s32 %v637_v29, %v633_v25  ;;  %v482_v55 = vor.u32 8388608, %v481_v51  ;;  %v488_v57 = vand.u32 31, %v486_v3  ;;  %v2590_v59 = vadd.f32 %v2499_v45, %v2379_v47 }
  0xde   : > { %v455_v35 = vsel %vm372_vm15, %v454_v16, %v453_v8  ;;  %v345_v33 = vor.u32 4788187, %v344_v24  ;;  %v348_v22 = vcvt.s32.f32 %v341_v18  ;;  %vm1307_vm11 = vcmp.eq.s32.totalorder %v2575_v37, 2 }
  0xdf   : > { %v458_v43 = vsel %vm2491_vm0, %v2391_v61, %v455_v35  ;;  %v639_v17 = vadd.s32 536870912, %v638_v0  ;;  %v489_v30 = vsub.s32 32, %v488_v57  ;;  %v2594_v60 = vmul.f32 %v2387_v54, %v233_v49 }
  0xe0   : > { %2221 = vcosq.f32 %v458_v43  ;;  %v346_v42 = vand.u32 2147483647, %v345_v33  ;;  %vm466_vm12 = vcmp.eq.s32.totalorder %v2584_v41, 0  ;;  %vm469_vm13 = vcmp.eq.s32.totalorder %v2584_v41, 2 }
  0xe1   : > { %2223 = vsinq.f32 %v458_v43  ;;  %vm1304_vm14 = vcmp.eq.s32.totalorder %v2575_v37, 0  ;;  %v2599_v1 = vand.u32 3, %v355_v50  ;;  %vm580_vm15 = vcmp.lt.s32.totalorder %v2404_v11, 0 }
  0xe2   : > { %v349_v58 = vmul.f32 %v348_v22, %v346_v42  ;;  %v2602_v47 = vshrl.u32 %v486_v3, 5  ;;  %vm465_vm0 = vcmp.lt.s32.totalorder %v2584_v41, 2  ;;  %vm1303_vm1 = vcmp.lt.s32.totalorder %v2575_v37, 2 }
  0xe3   : > { %v2606_v45 = vand.u32 3, %v359_v40  ;;  %v2609_v2 = vadd.s32 %v2561_v56, %v2557_v12  ;;  %v640_v4 = vshrl.u32 %v639_v17, 30  ;;  %v2611_v5 = vshll.u32 %v482_v55, 8 }
  0xe4   : > { %v350_v63 = vxor.u32 2147483648, %v349_v58  ;;  %vm462_vm3 = vweird.f32 %v2391_v61  ;;  %v491_v7 = vshll.u32 %v2278_v28, %v488_v57  ;;  %v786_v8 = vand.u32 2147483647, %v2590_v59 }
  0xe5   : > { %v789_v9 = vand.u32 2139095040, %v2590_v59  ;;  %vm2625_vm4 = vcmp.le.f32.partialorder %v578_v26, 0.7853982  ;;  %v641_v13 = vshll.u32 %v640_v4, 30  ;;  %v492_v14 = vshrl.u32 %v2279_v32, %v489_v30 }
  0xe6   : > { %v351_v6 = vsel %vm268_vm2, %v350_v63, %v349_v58  ;;  %v495_v56 = vshrl.u32 %v2280_v34, %v489_v30  ;;  %v494_v15 = vshll.u32 %v2279_v32, %v488_v57  ;;  %v498_v16 = vshrl.u32 %v2281_v36, %v489_v30 }
  0xe7   : > { %v354_v10 = vsel %vm2540_vm7, %v2393_v62, %v351_v6  ;;  %v501_v31 = vshrl.u32 %v2282_v38, %v489_v30  ;;  %vm506_vm2 = vcmp.lt.s32.totalorder %v2602_v47, 1  ;;  %v2635_v26 = vsub.s32 %v638_v0, %v641_v13 }
  0xe8   : > { %2225 = vcosq.f32 %v354_v10  ;;  %v664_v19 = vsub.s32 4, %v640_v4  ;;  %v497_v27 = vshll.u32 %v2280_v34, %v488_v57  ;;  %v500_v20 = vshll.u32 %v2281_v36, %v488_v57 }
  0xe9   : > { %2227 = vsinq.f32 %v354_v10  ;;  %v503_v51 = vshll.u32 %v2282_v38, %v488_v57  ;;  %v504_v35 = vshrl.u32 %v2283_v46, %v489_v30  ;;  %v644_v33 = vsub.s32 0, %v2635_v26 }
  0xea   : > { %v2222_v23 = vpop.eup %2221  ;;  %v493_v50 = vor.u32 %v492_v14, %v491_v7  ;;  %v496_v39 = vor.u32 %v495_v56, %v494_v15  ;;  %vm365_vm5 = vcmp.eq.s32.totalorder %v2606_v45, 2  ;;  %vm1204_vm6 = vcmp.eq.s32.totalorder %v2599_v1, 2 }
  0xeb   : > { %v2224_v18 = vpop.eup %2223  ;;  %v470_v24 = vxor.u32 2147483648, %v2222_v23  ;;  %v499_v42 = vor.u32 %v498_v16, %v497_v27  ;;  %v502_v22 = vor.u32 %v501_v31, %v500_v20  ;;  %vm362_vm7 = vcmp.eq.s32.totalorder %v2606_v45, 0 }
  0xec   : > { %v467_v43 = vxor.u32 2147483648, %v2224_v18  ;;  %vm1201_vm8 = vcmp.eq.s32.totalorder %v2599_v1, 0  ;;  %v2099_v40 = vmin.u32 %v644_v33, %v2635_v26  ;;  %v665_v0 = vsel %vm580_vm15, %v664_v19, %v640_v4 }
  0xed   : > { %v471_v25 = vsel %vm469_vm13, %v470_v24, %v2224_v18  ;;  %v1309_v3 = vsel %vm1307_vm11, %v470_v24, %v2224_v18  ;;  %vm361_vm9 = vcmp.lt.s32.totalorder %v2606_v45, 2  ;;  %vm1200_vm10 = vcmp.lt.s32.totalorder %v2599_v1, 2 }
  0xee   : > { %v468_v29 = vsel %vm466_vm12, %v2222_v23, %v467_v43  ;;  %v1306_v49 = vsel %vm1304_vm14, %v2222_v23, %v467_v43  ;;  %v490_v58 = vshrl.u32 %v2278_v28, %v489_v30  ;;  %v505_v17 = vor.u32 %v504_v35, %v503_v51 }
  0xef   : > { %v472_v55 = vsel %vm465_vm0, %v468_v29, %v471_v25  ;;  %v1310_v57 = vsel %vm1303_vm1, %v1306_v49, %v1309_v3  ;;  %vm358_vm11 = vweird.f32 %v2393_v62  ;;  %v646_v41 = vclz %v2099_v40 }
  0xf0   : > { %v473_v63 = vsel %vm462_vm3, nan, %v472_v55  ;;  %v1311_v6 = vsel %vm462_vm3, nan, %v1310_v57  ;;  %vm509_vm12 = vcmp.lt.s32.totalorder %v2602_v47, 4  ;;  %v2679_v37 = vsel %vm2625_vm4, 0, %v665_v0 }
  0xf1   : > { %1099 = vst [vmem:[%s2673_s30 + $0x8] sm:$0xff] %v473_v63  ;;  %1931 = vst [vmem:[%s2673_s30 + $0x48] sm:$0xff] %v1311_v6  ;;  %vm507_vm13 = vcmp.lt.s32.totalorder %v2602_v47, 2  ;;  %vm508_vm14 = vcmp.lt.s32.totalorder %v2602_v47, 3  ;;  %v511_v61 = vsel %vm509_vm12, %v499_v42, 2102212464  ;;  %v510_v4 = vsel %vm506_vm2, %v490_v58, %v493_v50 }
  0xf2   : > { %v2100_v30 = vadd.s32 4294967294, %v646_v41  ;;  %v514_v7 = vsel %vm506_vm2, %v493_v50, %v496_v39  ;;  %v515_v10 = vsel %vm509_vm12, %v502_v22, 920167782  ;;  %v2226_v13 = vpop.eup %2225  ;;  %v518_v56 = vsel %vm506_vm2, %v496_v39, %v499_v42 }
  0xf3   : > { %v516_v14 = vsel %vm508_vm14, %v499_v42, %v515_v10  ;;  %v519_v15 = vsel %vm509_vm12, %v505_v17, 1326507024  ;;  %v790_v16 = vshrl.u32 %v789_v9, 23  ;;  %v2228_v31 = vpop.eup %2227  ;;  %v366_v23 = vxor.u32 2147483648, %v2226_v13 }
  0xf4   : > { %vm2101_vm0 = vcmp.lt.s32.totalorder %v2100_v30, 0  ;;  %v512_v19 = vsel %vm508_vm14, %v496_v39, %v511_v61  ;;  %v520_v27 = vsel %vm508_vm14, %v502_v22, %v519_v15  ;;  %v363_v18 = vxor.u32 2147483648, %v2228_v31 }
  0xf5   : > { %v649_v24 = vsel %vm2101_vm0, 0, %v2100_v30  ;;  %v517_v20 = vsel %vm507_vm13, %v514_v7, %v516_v14  ;;  %v2106_v51 = vadd.s32 4294967169, %v790_v16  ;;  %v367_v35 = vsel %vm365_vm5, %v366_v23, %v2228_v31 }
  0xf6   : > { %v1206_v43 = vsel %vm1204_vm6, %v366_v23, %v2228_v31  ;;  %v650_v9 = vsub.s32 32, %v649_v24  ;;  %v521_v33 = vsel %vm507_vm13, %v518_v56, %v520_v27  ;;  %v364_v50 = vsel %vm362_vm7, %v2226_v13, %v363_v18 }
  0xf7   : > { %v1203_v39 = vsel %vm1201_vm8, %v2226_v13, %v363_v18  ;;  %v651_v25 = vshll.u32 %v2635_v26, %v649_v24  ;;  %v654_v3 = vsub.s32 4294967266, %v649_v24  ;;  %v368_v42 = vsel %vm361_vm9, %v364_v50, %v367_v35 }
  0xf8   : > { %v1207_v22 = vsel %vm1200_vm10, %v1203_v39, %v1206_v43  ;;  %v652_v29 = vshrl.u32 %v2609_v2, %v650_v9  ;;  %v796_v49 = vadd.s32 1, %v2106_v51  ;;  %v369_v40 = vsel %vm358_vm11, nan, %v368_v42 }
  0xf9   : > { %v1208_v0 = vsel %vm358_vm11, nan, %v1207_v22  ;;  %v655_v55 = vadd.s32 127, %v654_v3  ;;  %v513_v26 = vsel %vm507_vm13, %v510_v4, %v512_v19  ;;  %1098 = vst [vmem:[%s2673_s30] sm:$0xff] %v369_v40  ;;  %v671_v47 = vadd.s32 3, %v2679_v37 }
  0xfa   : > { %1930 = vst [vmem:[%s2673_s30 + $0x40] sm:$0xff] %v1208_v0  ;;  %v653_v45 = vor.u32 %v652_v29, %v651_v25  ;;  %v2718_v57 = vmul.u32.u64.low %v2611_v5, %v521_v33  ;;  %v2719_v1 = vmul.u32.u64.high %v2611_v5, %v521_v33, %v2718_v57  ;;  %vm797_vm1 = vcmp.gt.s32.totalorder %v796_v49, 0 }
  0xfb   : > { %v656_v2 = vshll.u32 %v655_v55, 23  ;;  %v2722_v58 = vmul.u32.u64.low %v2611_v5, %v517_v20  ;;  %v2723_v17 = vmul.u32.u64.high %v2611_v5, %v517_v20, %v2722_v58  ;;  %v798_v62 = vsel %vm797_vm1, %v796_v49, 0 }
  0xfc   : > { %v800_v63 = vand.u32 31, %v798_v62  ;;  %v529_v41 = vmul.u32 %v2611_v5, %v513_v26  ;;  %v2730_v61 = vadd.f32 %v2594_v60, %v2381_v48  ;;  %v660_v30 = vcvt.s32.f32 %v653_v45 }
  0xfd   : > { %v657_v6 = vor.u32 4788187, %v656_v2  ;;  %vm531_vm3 = vc.u32 %v2719_v1, %v2722_v58  ;;  %v793_v4 = vand.u32 8388607, %v786_v8  ;;  %v532_v13 = vadd.s32 1, %v2723_v17 }
  0xfe   : > { %v801_v7 = vsub.s32 32, %v800_v63  ;;  %v799_v14 = vshrl.u32 %v798_v62, 5  ;;  %v803_v56 = vshll.u32 %v2278_v28, %v800_v63  ;;  %v806_v15 = vshll.u32 %v2279_v32, %v800_v63 }
  0xff   : > { %v658_v10 = vand.u32 2147483647, %v657_v6  ;;  %v533_v31 = vsel %vm531_vm3, %v532_v13, %v2723_v17  ;;  %v812_v23 = vshll.u32 %v2281_v36, %v800_v63  ;;  %v809_v20 = vshll.u32 %v2280_v34, %v800_v63 }
 0x100   : > { %v804_v5 = vshrl.u32 %v2279_v32, %v801_v7  ;;  %v807_v48 = vshrl.u32 %v2280_v34, %v801_v7  ;;  %v810_v60 = vshrl.u32 %v2281_v36, %v801_v7  ;;  %v813_v19 = vshrl.u32 %v2282_v38, %v801_v7 }
 0x101   : > { %v661_v16 = vmul.f32 %v660_v30, %v658_v10  ;;  %v534_v27 = vadd.s32 %v533_v31, %v529_v41  ;;  %v815_v43 = vshll.u32 %v2282_v38, %v800_v63  ;;  %v816_v9 = vshrl.u32 %v2283_v46, %v801_v7 }
 0x102   : > { %v805_v18 = vor.u32 %v804_v5, %v803_v56  ;;  %v808_v24 = vor.u32 %v807_v48, %v806_v15  ;;  %v814_v35 = vor.u32 %v813_v19, %v812_v23  ;;  %v2748_v33 = vand.u32 3, %v671_v47 }
 0x103   : > { %v662_v51 = vxor.u32 2147483648, %v661_v16  ;;  %v2751_v50 = vand.u32 3, %v2679_v37  ;;  %v535_v39 = vadd.s32 536870912, %v534_v27  ;;  %v811_v25 = vor.u32 %v810_v60, %v809_v20 }
 0x104   : > { %v794_v42 = vor.u32 8388608, %v793_v4  ;;  %v802_v22 = vshrl.u32 %v2278_v28, %v801_v7  ;;  %v817_v29 = vor.u32 %v816_v9, %v815_v43  ;;  %vm818_vm2 = vcmp.lt.s32.totalorder %v799_v14, 1 }
 0x105   : > { %v663_v3 = vsel %vm580_vm15, %v662_v51, %v661_v16  ;;  %v536_v40 = vshrl.u32 %v535_v39, 30  ;;  %vm821_vm5 = vcmp.lt.s32.totalorder %v799_v14, 4  ;;  %vm820_vm6 = vcmp.lt.s32.totalorder %v799_v14, 3 }
 0x106   : > { %v666_v49 = vsel %vm2625_vm4, %v2404_v11, %v663_v3  ;;  %v826_v37 = vsel %vm818_vm2, %v805_v18, %v808_v24  ;;  %v827_v0 = vsel %vm821_vm5, %v814_v35, 920167782  ;;  %v823_v26 = vsel %vm821_vm5, %v811_v25, 2102212464 }
 0x107   : > { %2229 = vcosq.f32 %v666_v49  ;;  %v537_v55 = vshll.u32 %v536_v40, 30  ;;  %v830_v45 = vsel %vm818_vm2, %v808_v24, %v811_v25  ;;  %vm819_vm15 = vcmp.lt.s32.totalorder %v799_v14, 2 }
 0x108   : > { %2231 = vsinq.f32 %v666_v49  ;;  %v828_v57 = vsel %vm820_vm6, %v811_v25, %v827_v0  ;;  %v831_v2 = vsel %vm821_vm5, %v817_v29, 1326507024  ;;  %v834_v17 = vshll.u32 %v794_v42, 8 }
 0x109   : > { %v2759_v62 = vsub.s32 %v534_v27, %v537_v55  ;;  %v822_v63 = vsel %vm818_vm2, %v802_v22, %v805_v18  ;;  %v829_v12 = vsel %vm819_vm15, %v826_v37, %v828_v57  ;;  %v832_v6 = vsel %vm820_vm6, %v814_v35, %v831_v2 }
 0x10a   : > { %v824_v47 = vsel %vm820_vm6, %v808_v24, %v823_v26  ;;  %v833_v41 = vsel %vm819_vm15, %v830_v45, %v832_v6  ;;  %v2763_v30 = vmul.u32.u64.low %v834_v17, %v829_v12  ;;  %v2764_v4 = vmul.u32.u64.high %v834_v17, %v829_v12, %v2763_v30 }
 0x10b   : > { %v540_v7 = vsub.s32 0, %v2759_v62  ;;  %v560_v10 = vsub.s32 4, %v536_v40  ;;  %v685_v13 = vand.u32 2139095040, %v2730_v61  ;;  %vm476_vm4 = vcmp.lt.s32.totalorder %v2484_v21, 0 }
 0x10c   : > { %v2770_v56 = vmul.u32.u64.low %v834_v17, %v833_v41  ;;  %v2771_v5 = vmul.u32.u64.high %v834_v17, %v833_v41, %v2770_v56  ;;  %vm670_vm7 = vweird.f32 %v2404_v11  ;;  %vm1509_vm8 = vcmp.lt.s32.totalorder %v2751_v50, 2 }
 0x10d   : > { %vm2777_vm9 = vcmp.le.f32.partialorder %v474_v44, 0.7853982  ;;  %v2095_v48 = vmin.u32 %v540_v7, %v2759_v62  ;;  %v825_v60 = vsel %vm819_vm15, %v822_v63, %v824_v47  ;;  %vm673_vm10 = vcmp.lt.s32.totalorder %v2748_v33, 2 }
 0x10e   : > { %vm1510_vm11 = vcmp.eq.s32.totalorder %v2751_v50, 0  ;;  %v844_v16 = vadd.s32 1, %v2764_v4  ;;  %v686_v31 = vshrl.u32 %v685_v13, 23  ;;  %vm674_vm12 = vcmp.eq.s32.totalorder %v2748_v33, 0 }
 0x10f   : > { %vm677_vm13 = vcmp.eq.s32.totalorder %v2748_v33, 2  ;;  %v542_v23 = vclz %v2095_v48  ;;  %v561_v44 = vsel %vm476_vm4, %v560_v10, %v536_v40  ;;  %vm1513_vm14 = vcmp.eq.s32.totalorder %v2751_v50, 2 }
 0x110   : > { %v841_v14 = vmul.u32 %v834_v17, %v825_v60  ;;  %vm843_vm0 = vc.u32 %v2771_v5, %v2763_v30  ;;  %v2102_v27 = vadd.s32 4294967169, %v686_v31  ;;  %v682_v35 = vand.u32 2147483647, %v2730_v61 }
 0x111   : > { %v2230_v19 = vpop.eup %2229  ;;  %v2096_v20 = vadd.s32 4294967294, %v542_v23  ;;  %v845_v51 = vsel %vm843_vm0, %v844_v16, %v2764_v4  ;;  %v530_v9 = vadd.s32 %v2722_v58, %v2719_v1  ;;  %v563_v39 = vsel %vm2777_vm9, 0, %v561_v44  ;;  %v248_v58 = vpop.permute.xlu1 %247 }
 0x112   : > { %v2232_v18 = vpop.eup %2231  ;;  %v678_v24 = vxor.u32 2147483648, %v2230_v19  ;;  %v846_v25 = vadd.s32 %v845_v51, %v841_v14  ;;  %v692_v22 = vadd.s32 1, %v2102_v27  ;;  %v689_v26 = vand.u32 8388607, %v682_v35 }
 0x113   : > { %v675_v43 = vxor.u32 2147483648, %v2232_v18  ;;  %vm2097_vm1 = vcmp.lt.s32.totalorder %v2096_v20, 0  ;;  %v257_v50 = vmul.f32 %v2387_v54, %v248_v58  ;;  %v567_v41 = vadd.s32 3, %v563_v39 }
 0x114   : > { %v679_v3 = vsel %vm677_vm13, %v678_v24, %v2232_v18  ;;  %v1515_v42 = vsel %vm1513_vm14, %v678_v24, %v2232_v18  ;;  %v545_v40 = vsel %vm2097_vm1, 0, %v2096_v20  ;;  %v847_v1 = vadd.s32 536870912, %v846_v25 }
 0x115   : > { %v676_v29 = vsel %vm674_vm12, %v2230_v19, %v675_v43  ;;  %v1512_v49 = vsel %vm1510_vm11, %v2230_v19, %v675_v43  ;;  %v546_v55 = vsub.s32 32, %v545_v40  ;;  %v550_v2 = vsub.s32 4294967266, %v545_v40 }
 0x116   : > { %v680_v37 = vsel %vm673_vm10, %v676_v29, %v679_v3  ;;  %v1516_v0 = vsel %vm1509_vm8, %v1512_v49, %v1515_v42  ;;  %v2815_v17 = vshrl.u32 %v847_v1, 30  ;;  %vm693_vm3 = vcmp.gt.s32.totalorder %v692_v22, 0 }
 0x117   : > { %v681_v45 = vsel %vm670_vm7, nan, %v680_v37  ;;  %v1517_v57 = vsel %vm670_vm7, nan, %v1516_v0  ;;  %v548_v33 = vshrl.u32 %v530_v9, %v546_v55  ;;  %v547_v63 = vshll.u32 %v2759_v62, %v545_v40 }
 0x118   : > { %1101 = vst [vmem:[%s2673_s30 + $0x18] sm:$0xff] %v681_v45  ;;  %1933 = vst [vmem:[%s2673_s30 + $0x58] sm:$0xff] %v1517_v57  ;;  %v551_v12 = vadd.s32 127, %v550_v2  ;;  %v849_v6 = vshll.u32 %v2815_v17, 30  ;;  %v694_v47 = vsel %vm693_vm3, %v692_v22, 0  ;;  %v690_v13 = vor.u32 8388608, %v689_v26 }
 0x119   : > { %v696_v4 = vand.u32 31, %v694_v47  ;;  %v549_v7 = vor.u32 %v548_v33, %v547_v63  ;;  %v2822_v60 = vand.u32 3, %v563_v39  ;;  %v2825_v31 = vadd.f32 %v257_v50, %v2383_v52 }
 0x11a   : > { %v552_v11 = vshll.u32 %v551_v12, 23  ;;  %v850_v10 = vsub.s32 %v846_v25, %v849_v6  ;;  %v2827_v23 = vand.u32 3, %v567_v41  ;;  %v842_v62 = vadd.s32 %v2763_v30, %v2771_v5 }
 0x11b   : > { %v697_v56 = vsub.s32 32, %v696_v4  ;;  %v556_v27 = vcvt.s32.f32 %v549_v7  ;;  %v2833_v24 = vshll.u32 %v690_v13, 8  ;;  %v872_v20 = vsub.s32 4, %v2815_v17 }
 0x11c   : > { %v553_v48 = vor.u32 4788187, %v552_v11  ;;  %v852_v16 = vsub.s32 0, %v850_v10  ;;  %v2836_v51 = vshrl.u32 %v694_v47, 5  ;;  %v699_v52 = vshll.u32 %v2278_v28, %v696_v4 }
 0x11d   : > { %v700_v44 = vshrl.u32 %v2279_v32, %v697_v56  ;;  %v703_v19 = vshrl.u32 %v2280_v34, %v697_v56  ;;  %v702_v43 = vshll.u32 %v2279_v32, %v696_v4  ;;  %v698_v30 = vshrl.u32 %v2278_v28, %v697_v56 }
 0x11e   : > { %v554_v14 = vand.u32 2147483647, %v553_v48  ;;  %v2107_v18 = vmin.u32 %v852_v16, %v850_v10  ;;  %v997_v5 = vand.u32 2139095040, %v2825_v31  ;;  %v705_v42 = vshll.u32 %v2280_v34, %v696_v4 }
 0x11f   : > { %v701_v25 = vor.u32 %v700_v44, %v699_v52  ;;  %v704_v3 = vor.u32 %v703_v19, %v702_v43  ;;  %v706_v22 = vshrl.u32 %v2281_v36, %v697_v56  ;;  %vm788_vm2 = vcmp.lt.s32.totalorder %v2590_v59, 0 }
 0x120   : > { %v557_v9 = vmul.f32 %v556_v27, %v554_v14  ;;  %v854_v39 = vclz %v2107_v18  ;;  %v708_v40 = vshll.u32 %v2281_v36, %v696_v4  ;;  %v709_v1 = vshrl.u32 %v2282_v38, %v697_v56 }
 0x121   : > { %v707_v58 = vor.u32 %v706_v22, %v705_v42  ;;  %v711_v37 = vshll.u32 %v2282_v38, %v696_v4  ;;  %v712_v0 = vshrl.u32 %v2283_v46, %v697_v56  ;;  %vm714_vm5 = vcmp.lt.s32.totalorder %v2836_v51, 1 }
 0x122   : > { %v558_v29 = vxor.u32 2147483648, %v557_v9  ;;  %v2108_v49 = vadd.s32 4294967294, %v854_v39  ;;  %v710_v26 = vor.u32 %v709_v1, %v708_v40  ;;  %vm715_vm15 = vcmp.lt.s32.totalorder %v2836_v51, 2  ;;  %v243_v39 = vpop.permute.xlu0 %242 }
 0x123   : > { %vm2858_vm7 = vcmp.le.f32.partialorder %v786_v8, 0.7853982  ;;  %v713_v33 = vor.u32 %v712_v0, %v711_v37  ;;  %vm716_vm8 = vcmp.lt.s32.totalorder %v2836_v51, 3  ;;  %v722_v15 = vsel %vm714_vm5, %v701_v25, %v704_v3 }
 0x124   : > { %v559_v55 = vsel %vm476_vm4, %v558_v29, %v557_v9  ;;  %vm2109_vm6 = vcmp.lt.s32.totalorder %v2108_v49, 0  ;;  %vm717_vm4 = vcmp.lt.s32.totalorder %v2836_v51, 4  ;;  %v718_v41 = vsel %vm714_vm5, %v698_v30, %v701_v25 }
 0x125   : > { %v562_v45 = vsel %vm2777_vm9, %v2484_v21, %v559_v55  ;;  %v857_v2 = vsel %vm2109_vm6, 0, %v2108_v49  ;;  %v719_v6 = vsel %vm717_vm4, %v707_v58, 2102212464  ;;  %v723_v4 = vsel %vm717_vm4, %v710_v26, 920167782 }
 0x126   : > { %2233 = vcosq.f32 %v562_v45  ;;  %v858_v50 = vsub.s32 32, %v857_v2  ;;  %v862_v63 = vsub.s32 4294967266, %v857_v2  ;;  %v859_v12 = vshll.u32 %v850_v10, %v857_v2 }
 0x127   : > { %2235 = vsinq.f32 %v562_v45  ;;  %v720_v7 = vsel %vm716_vm8, %v704_v3, %v719_v6  ;;  %v724_v11 = vsel %vm716_vm8, %v707_v58, %v723_v4  ;;  %v726_v13 = vsel %vm714_vm5, %v704_v3, %v707_v58 }
 0x128   : > { %v860_v47 = vshrl.u32 %v842_v62, %v858_v50  ;;  %v863_v8 = vadd.s32 127, %v862_v63  ;;  %v727_v10 = vsel %vm717_vm4, %v713_v33, 1326507024  ;;  %v725_v16 = vsel %vm715_vm15, %v722_v15, %v724_v11 }
 0x129   : > { %v728_v62 = vsel %vm716_vm8, %v710_v26, %v727_v10  ;;  %vm1407_vm9 = vcmp.eq.s32.totalorder %v2822_v60, 0  ;;  %v873_v44 = vsel %vm788_vm2, %v872_v20, %v2815_v17  ;;  %vm1406_vm10 = vcmp.lt.s32.totalorder %v2822_v60, 2 }
 0x12a   : > { %v861_v56 = vor.u32 %v860_v47, %v859_v12  ;;  %v864_v48 = vshll.u32 %v863_v8, 23  ;;  %v729_v19 = vsel %vm715_vm15, %v726_v13, %v728_v62  ;;  %v994_v9 = vand.u32 2147483647, %v2825_v31 }
 0x12b   : > { %v2885_v14 = vmul.u32.u64.low %v2833_v24, %v725_v16  ;;  %v2886_v27 = vmul.u32.u64.high %v2833_v24, %v725_v16, %v2885_v14  ;;  %v2891_v52 = vmul.u32.u64.low %v2833_v24, %v729_v19  ;;  %v2892_v43 = vmul.u32.u64.high %v2833_v24, %v729_v19, %v2891_v52 }
 0x12c   : > { %v865_v18 = vor.u32 4788187, %v864_v48  ;;  %vm566_vm11 = vweird.f32 %v2484_v21  ;;  %vm569_vm12 = vcmp.lt.s32.totalorder %v2827_v23, 2  ;;  %vm1410_vm13 = vcmp.eq.s32.totalorder %v2822_v60, 2 }
 0x12d   : > { %v721_v17 = vsel %vm715_vm15, %v718_v41, %v720_v7  ;;  %v998_v20 = vshrl.u32 %v997_v5, 23  ;;  %vm570_vm14 = vcmp.eq.s32.totalorder %v2827_v23, 0  ;;  %v868_v25 = vcvt.s32.f32 %v861_v56 }
 0x12e   : > { %v866_v30 = vand.u32 2147483647, %v865_v18  ;;  %v875_v3 = vsel %vm2858_vm7, 0, %v873_v44  ;;  %vm573_vm0 = vcmp.eq.s32.totalorder %v2827_v23, 2  ;;  %v740_v42 = vadd.s32 1, %v2886_v27 }
 0x12f   : > { %v2114_v22 = vadd.s32 4294967169, %v998_v20  ;;  %v256_v29 = vmul.f32 %v2387_v54, %v243_v39  ;;  %v737_v51 = vmul.u32 %v2833_v24, %v721_v17  ;;  %vm739_vm1 = vc.u32 %v2892_v43, %v2885_v14 }
 0x130   : > { %v2234_v49 = vpop.eup %2233  ;;  %v869_v40 = vmul.f32 %v868_v25, %v866_v30  ;;  %v1001_v5 = vand.u32 8388607, %v994_v9  ;;  %v879_v37 = vadd.s32 3, %v875_v3  ;;  %v741_v0 = vsel %vm739_vm1, %v740_v42, %v2886_v27 }
 0x131   : > { %v2236_v1 = vpop.eup %2235  ;;  %v574_v58 = vxor.u32 2147483648, %v2234_v49  ;;  %v1004_v55 = vadd.s32 1, %v2114_v22  ;;  %v2912_v2 = vand.u32 3, %v875_v3  ;;  %v742_v54 = vadd.s32 %v741_v0, %v737_v51 }
 0x132   : > { %v571_v26 = vxor.u32 2147483648, %v2236_v1  ;;  %v870_v45 = vxor.u32 2147483648, %v869_v40  ;;  %v2919_v50 = vadd.f32 %v256_v29, %v2385_v53  ;;  %v880_v23 = vand.u32 3, %v879_v37 }
 0x133   : > { %v575_v24 = vsel %vm573_vm0, %v574_v58, %v2236_v1  ;;  %v1412_v33 = vsel %vm1410_vm13, %v574_v58, %v2236_v1  ;;  %vm1005_vm3 = vcmp.gt.s32.totalorder %v1004_v55, 0  ;;  %v743_v15 = vadd.s32 536870912, %v742_v54 }
 0x134   : > { %v572_v63 = vsel %vm570_vm14, %v2234_v49, %v571_v26  ;;  %v1409_v12 = vsel %vm1407_vm9, %v2234_v49, %v571_v26  ;;  %v871_v6 = vsel %vm788_vm2, %v870_v45, %v869_v40  ;;  %v1006_v41 = vsel %vm1005_vm3, %v1004_v55, 0 }
 0x135   : > { %v576_v47 = vsel %vm569_vm12, %v572_v63, %v575_v24  ;;  %v1413_v8 = vsel %vm1406_vm10, %v1409_v12, %v1412_v33  ;;  %v874_v53 = vsel %vm2858_vm7, %v2590_v59, %v871_v6  ;;  %v2938_v11 = vshrl.u32 %v743_v15, 30 }
 0x136   : > { %v577_v4 = vsel %vm566_vm11, nan, %v576_v47  ;;  %v1414_v7 = vsel %vm566_vm11, nan, %v1413_v8  ;;  %2237 = vcosq.f32 %v874_v53  ;;  %v1002_v60 = vor.u32 8388608, %v1001_v5 }
 0x137   : > { %1100 = vst [vmem:[%s2673_s30 + $0x10] sm:$0xff] %v577_v4  ;;  %1932 = vst [vmem:[%s2673_s30 + $0x50] sm:$0xff] %v1414_v7  ;;  %2239 = vsinq.f32 %v874_v53  ;;  %v1008_v13 = vand.u32 31, %v1006_v41  ;;  %v745_v10 = vshll.u32 %v2938_v11, 30  ;;  %v893_v48 = vand.u32 2139095040, %v2919_v50 }
 0x138   : > { %vm882_vm2 = vcmp.eq.s32.totalorder %v880_v23, 0  ;;  %vm885_vm5 = vcmp.eq.s32.totalorder %v880_v23, 2  ;;  %vm1716_vm6 = vcmp.eq.s32.totalorder %v2912_v2, 0  ;;  %vm1719_vm15 = vcmp.eq.s32.totalorder %v2912_v2, 2 }
 0x139   : > { %v1009_v57 = vsub.s32 32, %v1008_v13  ;;  %v2943_v56 = vsub.s32 %v742_v54, %v745_v10  ;;  %v2948_v21 = vshll.u32 %v1002_v60, 8  ;;  %vm881_vm7 = vcmp.lt.s32.totalorder %v880_v23, 2 }
 0x13a   : > { %vm1715_vm8 = vcmp.lt.s32.totalorder %v2912_v2, 2  ;;  %v738_v16 = vadd.s32 %v2885_v14, %v2892_v43  ;;  %vm878_vm4 = vweird.f32 %v2590_v59  ;;  %v2957_v27 = vshrl.u32 %v1006_v41, 5 }
 0x13b   : > { %v748_v62 = vsub.s32 0, %v2943_v56  ;;  %v1012_v44 = vshrl.u32 %v2279_v32, %v1009_v57  ;;  %v1015_v19 = vshrl.u32 %v2280_v34, %v1009_v57  ;;  %v1018_v18 = vshrl.u32 %v2281_v36, %v1009_v57 }
 0x13c   : > { %v1021_v52 = vshrl.u32 %v2282_v38, %v1009_v57  ;;  %v1024_v39 = vshrl.u32 %v2283_v46, %v1009_v57  ;;  %v1011_v14 = vshll.u32 %v2278_v28, %v1008_v13  ;;  %v1014_v43 = vshll.u32 %v2279_v32, %v1008_v13 }
 0x13d   : > { %v2103_v17 = vmin.u32 %v748_v62, %v2943_v56  ;;  %v894_v20 = vshrl.u32 %v893_v48, 23  ;;  %v768_v30 = vsub.s32 4, %v2938_v11  ;;  %v1017_v25 = vshll.u32 %v2280_v34, %v1008_v13 }
 0x13e   : > { %v1020_v3 = vshll.u32 %v2281_v36, %v1008_v13  ;;  %v1023_v42 = vshll.u32 %v2282_v38, %v1008_v13  ;;  %v1010_v49 = vshrl.u32 %v2278_v28, %v1009_v57  ;;  %v1013_v40 = vor.u32 %v1012_v44, %v1011_v14 }
 0x13f   : > { %v750_v29 = vclz %v2103_v17  ;;  %v1016_v51 = vor.u32 %v1015_v19, %v1014_v43  ;;  %v1019_v58 = vor.u32 %v1018_v18, %v1017_v25  ;;  %vm1026_vm9 = vcmp.lt.s32.totalorder %v2957_v27, 1 }
 0x140   : > { %v2238_v22 = vpop.eup %2237  ;;  %v1022_v37 = vor.u32 %v1021_v52, %v1020_v3  ;;  %v1025_v0 = vor.u32 %v1024_v39, %v1023_v42  ;;  %vm1027_vm10 = vcmp.lt.s32.totalorder %v2957_v27, 2  ;;  %vm1028_vm11 = vcmp.lt.s32.totalorder %v2957_v27, 3 }
 0x141   : > { %v2240_v5 = vpop.eup %2239  ;;  %v886_v1 = vxor.u32 2147483648, %v2238_v22  ;;  %v2104_v26 = vadd.s32 4294967294, %v750_v29  ;;  %vm1029_vm12 = vcmp.lt.s32.totalorder %v2957_v27, 4  ;;  %v1030_v63 = vsel %vm1026_vm9, %v1010_v49, %v1013_v40 }
 0x142   : > { %v883_v55 = vxor.u32 2147483648, %v2240_v5  ;;  %v1031_v47 = vsel %vm1029_vm12, %v1019_v58, 2102212464  ;;  %v1034_v4 = vsel %vm1026_vm9, %v1013_v40, %v1016_v51  ;;  %v1035_v2 = vsel %vm1029_vm12, %v1022_v37, 920167782 }
 0x143   : > { %v887_v45 = vsel %vm885_vm5, %v886_v1, %v2240_v5  ;;  %v1721_v54 = vsel %vm1719_vm15, %v886_v1, %v2240_v5  ;;  %vm2105_vm13 = vcmp.lt.s32.totalorder %v2104_v26, 0  ;;  %v1038_v23 = vsel %vm1026_vm9, %v1016_v51, %v1019_v58 }
 0x144   : > { %v884_v24 = vsel %vm882_vm2, %v2238_v22, %v883_v55  ;;  %v1718_v33 = vsel %vm1716_vm6, %v2238_v22, %v883_v55  ;;  %v753_v15 = vsel %vm2105_vm13, 0, %v2104_v26  ;;  %v1039_v60 = vsel %vm1029_vm12, %v1025_v0, 1326507024 }
 0x145   : > { %v888_v12 = vsel %vm881_vm7, %v884_v24, %v887_v45  ;;  %v1722_v6 = vsel %vm1715_vm8, %v1718_v33, %v1721_v54  ;;  %v754_v41 = vsub.s32 32, %v753_v15  ;;  %v758_v7 = vsub.s32 4294967266, %v753_v15 }
 0x146   : > { %v889_v8 = vsel %vm878_vm4, nan, %v888_v12  ;;  %v1723_v53 = vsel %vm878_vm4, nan, %v1722_v6  ;;  %v755_v13 = vshll.u32 %v2943_v56, %v753_v15  ;;  %v1036_v10 = vsel %vm1028_vm11, %v1019_v58, %v1035_v2 }
 0x147   : > { %1103 = vst [vmem:[%s2673_s30 + $0x28] sm:$0xff] %v889_v8  ;;  %1935 = vst [vmem:[%s2673_s30 + $0x68] sm:$0xff] %v1723_v53  ;;  %v756_v59 = vshrl.u32 %v738_v16, %v754_v41  ;;  %v1040_v57 = vsel %vm1028_vm11, %v1022_v37, %v1039_v60  ;;  %v759_v48 = vadd.s32 127, %v758_v7  ;;  %v1037_v62 = vsel %vm1027_vm10, %v1034_v4, %v1036_v10 }
 0x148   : > { %v1041_v44 = vsel %vm1027_vm10, %v1038_v23, %v1040_v57  ;;  %v2110_v19 = vadd.s32 4294967169, %v894_v20  ;;  %v1032_v52 = vsel %vm1028_vm11, %v1016_v51, %v1031_v47  ;;  %v890_v25 = vand.u32 2147483647, %v2919_v50 }
 0x149   : > { %v757_v18 = vor.u32 %v756_v59, %v755_v13  ;;  %v3013_v56 = vmul.u32.u64.low %v2948_v21, %v1041_v44  ;;  %v3014_v16 = vmul.u32.u64.high %v2948_v21, %v1041_v44, %v3013_v56  ;;  %v760_v39 = vshll.u32 %v759_v48, 23 }
 0x14a   : > { %v3017_v17 = vmul.u32.u64.low %v2948_v21, %v1037_v62  ;;  %v3018_v14 = vmul.u32.u64.high %v2948_v21, %v1037_v62, %v3017_v17  ;;  %v900_v43 = vadd.s32 1, %v2110_v19  ;;  %vm684_vm14 = vcmp.lt.s32.totalorder %v2730_v61, 0 }
 0x14b   : > { %v761_v20 = vor.u32 4788187, %v760_v39  ;;  %v1033_v3 = vsel %vm1027_vm10, %v1030_v63, %v1032_v52  ;;  %v769_v42 = vsel %vm684_vm14, %v768_v30, %v2938_v11  ;;  %v764_v49 = vcvt.s32.f32 %v757_v18 }
 0x14c   : > { %vm901_vm0 = vcmp.gt.s32.totalorder %v900_v43, 0  ;;  %vm1051_vm1 = vc.u32 %v3014_v16, %v3017_v17  ;;  %v1052_v40 = vadd.s32 1, %v3018_v14  ;;  %vm3033_vm3 = vcmp.le.f32.partialorder %v682_v35, 0.7853982 }
 0x14d   : > { %v902_v22 = vsel %vm901_vm0, %v900_v43, 0  ;;  %v762_v29 = vand.u32 2147483647, %v761_v20  ;;  %v1049_v27 = vmul.u32 %v2948_v21, %v1033_v3  ;;  %v897_v11 = vand.u32 8388607, %v890_v25 }
 0x14e   : > { %v904_v51 = vand.u32 31, %v902_v22  ;;  %v771_v1 = vsel %vm3033_vm3, 0, %v769_v42  ;;  %v1053_v58 = vsel %vm1051_vm1, %v1052_v40, %v3018_v14  ;;  %v3043_v55 = vshrl.u32 %v902_v22, 5 }
 0x14f   : > { %v765_v30 = vmul.f32 %v764_v49, %v762_v29  ;;  %v1054_v0 = vadd.s32 %v1053_v58, %v1049_v27  ;;  %v775_v23 = vadd.s32 3, %v771_v1  ;;  %v898_v60 = vor.u32 8388608, %v897_v11 }
 0x150   : > { %v905_v37 = vsub.s32 32, %v904_v51  ;;  %v907_v35 = vshll.u32 %v2278_v28, %v904_v51  ;;  %v910_v26 = vshll.u32 %v2279_v32, %v904_v51  ;;  %v913_v24 = vshll.u32 %v2280_v34, %v904_v51 }
 0x151   : > { %v766_v45 = vxor.u32 2147483648, %v765_v30  ;;  %v1055_v33 = vadd.s32 536870912, %v1054_v0  ;;  %v916_v12 = vshll.u32 %v2281_v36, %v904_v51  ;;  %v919_v8 = vshll.u32 %v2282_v38, %v904_v51 }
 0x152   : > { %v908_v21 = vshrl.u32 %v2279_v32, %v905_v37  ;;  %v911_v54 = vshrl.u32 %v2280_v34, %v905_v37  ;;  %v914_v63 = vshrl.u32 %v2281_v36, %v905_v37  ;;  %v917_v6 = vshrl.u32 %v2282_v38, %v905_v37 }
 0x153   : > { %v767_v15 = vsel %vm684_vm14, %v766_v45, %v765_v30  ;;  %v920_v53 = vshrl.u32 %v2283_v46, %v905_v37  ;;  %v3060_v34 = vshrl.u32 %v1055_v33, 30  ;;  %vm922_vm2 = vcmp.lt.s32.totalorder %v3043_v55, 1 }
 0x154   : > { %v909_v47 = vor.u32 %v908_v21, %v907_v35  ;;  %v770_v32 = vsel %vm3033_vm3, %v2730_v61, %v767_v15  ;;  %v912_v41 = vor.u32 %v911_v54, %v910_v26  ;;  %v918_v4 = vor.u32 %v917_v6, %v916_v12 }
 0x155   : > { %2241 = vcosq.f32 %v770_v32  ;;  %v915_v36 = vor.u32 %v914_v63, %v913_v24  ;;  %v921_v7 = vor.u32 %v920_v53, %v919_v8  ;;  %v1057_v2 = vshll.u32 %v3060_v34, 30 }
 0x156   : > { %2243 = vsinq.f32 %v770_v32  ;;  %vm925_vm5 = vcmp.lt.s32.totalorder %v3043_v55, 4  ;;  %vm924_vm6 = vcmp.lt.s32.totalorder %v3043_v55, 3  ;;  %v930_v46 = vsel %vm922_vm2, %v909_v47, %v912_v41 }
 0x157   : > { %v1058_v38 = vsub.s32 %v1054_v0, %v1057_v2  ;;  %v931_v13 = vsel %vm925_vm5, %v918_v4, 920167782  ;;  %v935_v10 = vsel %vm925_vm5, %v921_v7, 1326507024  ;;  %v1611_v57 = vand.u32 3, %v771_v1 }
 0x158   : > { %v932_v59 = vsel %vm924_vm6, %v915_v36, %v931_v13  ;;  %vm923_vm15 = vcmp.lt.s32.totalorder %v3043_v55, 2  ;;  %v934_v62 = vsel %vm922_vm2, %v912_v41, %v915_v36  ;;  %v927_v44 = vsel %vm925_vm5, %v915_v36, 2102212464 }
 0x159   : > { %v1060_v48 = vsub.s32 0, %v1058_v38  ;;  %v933_v19 = vsel %vm923_vm15, %v930_v46, %v932_v59  ;;  %v936_v18 = vsel %vm924_vm6, %v918_v4, %v935_v10  ;;  %v938_v52 = vshll.u32 %v898_v60, 8 }
 0x15a   : > { %v776_v56 = vand.u32 3, %v775_v23  ;;  %v906_v14 = vshrl.u32 %v2278_v28, %v905_v37  ;;  %v937_v43 = vsel %vm923_vm15, %v934_v62, %v936_v18  ;;  %vm774_vm7 = vweird.f32 %v2730_v61 }
 0x15b   : > { %v2115_v39 = vmin.u32 %v1060_v48, %v1058_v38  ;;  %v3080_v20 = vmul.u32.u64.low %v938_v52, %v933_v19  ;;  %v3081_v3 = vmul.u32.u64.high %v938_v52, %v933_v19, %v3080_v20  ;;  %v928_v29 = vsel %vm924_vm6, %v912_v41, %v927_v44 }
 0x15c   : > { %v926_v22 = vsel %vm922_vm2, %v906_v14, %v909_v47  ;;  %vm1612_vm8 = vcmp.lt.s32.totalorder %v1611_v57, 2  ;;  %vm1613_vm4 = vcmp.eq.s32.totalorder %v1611_v57, 0  ;;  %vm777_vm9 = vcmp.lt.s32.totalorder %v776_v56, 2 }
 0x15d   : > { %v1062_v42 = vclz %v2115_v39  ;;  %v3089_v28 = vmul.u32.u64.low %v938_v52, %v937_v43  ;;  %v3090_v40 = vmul.u32.u64.high %v938_v52, %v937_v43, %v3089_v28  ;;  %vm1616_vm10 = vcmp.eq.s32.totalorder %v1611_v57, 2 }
 0x15e   : > { %vm778_vm11 = vcmp.eq.s32.totalorder %v776_v56, 0  ;;  %vm781_vm12 = vcmp.eq.s32.totalorder %v776_v56, 2  ;;  %v929_v30 = vsel %vm923_vm15, %v926_v22, %v928_v29  ;;  %v948_v37 = vadd.s32 1, %v3081_v3 }
 0x15f   : > { %v2242_v49 = vpop.eup %2241  ;;  %v2116_v27 = vadd.s32 4294967294, %v1062_v42  ;;  %v1050_v26 = vadd.s32 %v3017_v17, %v3014_v16  ;;  %v945_v24 = vmul.u32 %v938_v52, %v929_v30  ;;  %vm947_vm14 = vc.u32 %v3090_v40, %v3080_v20 }
 0x160   : > { %v2244_v51 = vpop.eup %2243  ;;  %v782_v5 = vxor.u32 2147483648, %v2242_v49  ;;  %v949_v17 = vsel %vm947_vm14, %v948_v37, %v3081_v3  ;;  %v1080_v23 = vsub.s32 4, %v3060_v34  ;;  %vm996_vm0 = vcmp.lt.s32.totalorder %v2825_v31, 0 }
 0x161   : > { %v779_v11 = vxor.u32 2147483648, %v2244_v51  ;;  %vm2117_vm13 = vcmp.lt.s32.totalorder %v2116_v27, 0  ;;  %v950_v47 = vadd.s32 %v949_v17, %v945_v24  ;;  %vm995_vm1 = vcmp.le.f32.partialorder %v994_v9, 0.7853982 }
 0x162   : > { %v783_v1 = vsel %vm781_vm12, %v782_v5, %v2244_v51  ;;  %v1618_v58 = vsel %vm1616_vm10, %v782_v5, %v2244_v51  ;;  %v1065_v45 = vsel %vm2117_vm13, 0, %v2116_v27  ;;  %v1081_v59 = vsel %vm996_vm0, %v1080_v23, %v3060_v34 }
 0x163   : > { %v780_v0 = vsel %vm778_vm11, %v2242_v49, %v779_v11  ;;  %v1615_v35 = vsel %vm1613_vm4, %v2242_v49, %v779_v11  ;;  %v1066_v55 = vsub.s32 32, %v1065_v45  ;;  %v1070_v12 = vsub.s32 4294967266, %v1065_v45 }
 0x164   : > { %v784_v21 = vsel %vm777_vm9, %v780_v0, %v783_v1  ;;  %v1619_v54 = vsel %vm1612_vm8, %v1615_v35, %v1618_v58  ;;  %v1067_v6 = vshll.u32 %v1058_v38, %v1065_v45  ;;  %v951_v32 = vadd.s32 536870912, %v950_v47 }
 0x165   : > { %v785_v33 = vsel %vm774_vm7, nan, %v784_v21  ;;  %v1620_v63 = vsel %vm774_vm7, nan, %v1619_v54  ;;  %v1068_v16 = vshrl.u32 %v1050_v26, %v1066_v55  ;;  %v1071_v15 = vadd.s32 127, %v1070_v12 }
 0x166   : > { %1102 = vst [vmem:[%s2673_s30 + $0x20] sm:$0xff] %v785_v33  ;;  %1934 = vst [vmem:[%s2673_s30 + $0x60] sm:$0xff] %v1620_v63  ;;  %v3109_v4 = vshrl.u32 %v951_v32, 30  ;;  %v1083_v62 = vsel %vm995_vm1, 0, %v1081_v59  ;;  %v946_v52 = vadd.s32 %v3080_v20, %v3090_v40  ;;  %vm1086_vm4 = vweird.f32 %v2825_v31  ;;  %v2022_v59 = vld [vmem:[%s2673_s30 + $0x48] sm:$0xff] (%p2324_p4) }
 0x167   : > { %v1069_v8 = vor.u32 %v1068_v16, %v1067_v6  ;;  %v1072_v53 = vshll.u32 %v1071_v15, 23  ;;  %v1087_v19 = vadd.s32 3, %v1083_v62  ;;  %v1920_v9 = vand.u32 3, %v1083_v62  ;;  %2023 = vst [vmem:[%s1946_s6 + $0x90] sm:$0xff] (%p2324_p4), %v2022_v59  ;;  %v2030_v62 = vld [vmem:[%s2673_s30 + $0x68] sm:$0xff] (%p2324_p4) }
 0x168   : > { %v953_v7 = vshll.u32 %v3109_v4, 30  ;;  %v976_v45 = vsub.s32 4, %v3109_v4  ;;  %vm892_vm9 = vcmp.lt.s32.totalorder %v2919_v50, 0  ;;  %vm891_vm10 = vcmp.le.f32.partialorder %v890_v25, 0.7853982  ;;  %2031 = vst [vmem:[%s1946_s6 + $0xd0] sm:$0xff] (%p2324_p4), %v2030_v62 }
 0x169   : > { %v1073_v41 = vor.u32 4788187, %v1072_v53  ;;  %v1076_v36 = vcvt.s32.f32 %v1069_v8  ;;  %v1088_v14 = vand.u32 3, %v1087_v19  ;;  %vm1921_vm2 = vcmp.lt.s32.totalorder %v1920_v9, 2 }
 0x16a   : > { %v954_v60 = vsub.s32 %v950_v47, %v953_v7  ;;  %vm1922_vm5 = vcmp.eq.s32.totalorder %v1920_v9, 0  ;;  %vm1925_vm15 = vcmp.eq.s32.totalorder %v1920_v9, 2  ;;  %v977_v55 = vsel %vm892_vm9, %v976_v45, %v3109_v4  ;;  %v2008_v7 = vld [vmem:[%s2673_s30 + $0x10] sm:$0xff] (%p2324_p4) }
 0x16b   : > { %v1074_v61 = vand.u32 2147483647, %v1073_v41  ;;  %vm1093_vm6 = vcmp.eq.s32.totalorder %v1088_v14, 2  ;;  %vm1089_vm7 = vcmp.lt.s32.totalorder %v1088_v14, 2  ;;  %vm1090_vm8 = vcmp.eq.s32.totalorder %v1088_v14, 0  ;;  %2009 = vst [vmem:[%s1946_s6 + $0x20] sm:$0xff] (%p2324_p4), %v2008_v7 }
 0x16c   : > { %v956_v13 = vsub.s32 0, %v954_v60  ;;  %v979_v24 = vsel %vm891_vm10, 0, %v977_v55 }
 0x16d   : > { %v1077_v2 = vmul.f32 %v1076_v36, %v1074_v61  ;;  %v983_v33 = vadd.s32 3, %v979_v24  ;;  %v1817_v12 = vand.u32 3, %v979_v24  ;;  %v2006_v36 = vld [vmem:[%s2673_s30 + $0x8] sm:$0xff] (%p2324_p4)  ;;  %v2012_v23 = vld [vmem:[%s2673_s30 + $0x20] sm:$0xff] (%p2324_p4) }
 0x16e   : > { %v2111_v10 = vmin.u32 %v956_v13, %v954_v60  ;;  %2007 = vst [vmem:[%s1946_s6 + $0x10] sm:$0xff] (%p2324_p4), %v2006_v36  ;;  %2013 = vst [vmem:[%s1946_s6 + $0x40] sm:$0xff] (%p2324_p4), %v2012_v23 }
 0x16f   : > { %v1078_v46 = vxor.u32 2147483648, %v1077_v2  ;;  %v984_v63 = vand.u32 3, %v983_v33  ;;  %vm1822_vm12 = vcmp.eq.s32.totalorder %v1817_v12, 2  ;;  %vm1819_vm14 = vcmp.eq.s32.totalorder %v1817_v12, 0 }
 0x170   : > { %v958_v48 = vclz %v2111_v10  ;;  %v2024_v10 = vld [vmem:[%s2673_s30 + $0x50] sm:$0xff] (%p2324_p4) }
 0x171   : > { %v1079_v38 = vsel %vm996_vm0, %v1078_v46, %v1077_v2  ;;  %vm989_vm11 = vcmp.eq.s32.totalorder %v984_v63, 2  ;;  %vm986_vm13 = vcmp.eq.s32.totalorder %v984_v63, 0  ;;  %vm985_vm0 = vcmp.lt.s32.totalorder %v984_v63, 2  ;;  %v2010_v2 = vld [vmem:[%s2673_s30 + $0x18] sm:$0xff] (%p2324_p4)  ;;  %2025 = vst [vmem:[%s1946_s6 + $0xa0] sm:$0xff] (%p2324_p4), %v2024_v10 }
 0x172   : > { %v1082_v57 = vsel %vm995_vm1, %v2825_v31, %v1079_v38  ;;  %v2112_v44 = vadd.s32 4294967294, %v958_v48  ;;  %vm1818_vm1 = vcmp.lt.s32.totalorder %v1817_v12, 2  ;;  %2011 = vst [vmem:[%s1946_s6 + $0x30] sm:$0xff] (%p2324_p4), %v2010_v2  ;;  %v2020_v38 = vld [vmem:[%s2673_s30 + $0x40] sm:$0xff] (%p2324_p4) }
 0x173   : > { %2245 = vcosq.f32 %v1082_v57  ;;  %2021 = vst [vmem:[%s1946_s6 + $0x80] sm:$0xff] (%p2324_p4), %v2020_v38  ;;  %v2028_v48 = vld [vmem:[%s2673_s30 + $0x60] sm:$0xff] (%p2324_p4) }
 0x174   : > { %2247 = vsinq.f32 %v1082_v57  ;;  %vm2113_vm3 = vcmp.lt.s32.totalorder %v2112_v44, 0  ;;  %v2026_v57 = vld [vmem:[%s2673_s30 + $0x58] sm:$0xff] (%p2324_p4)  ;;  %2029 = vst [vmem:[%s1946_s6 + $0xc0] sm:$0xff] (%p2324_p4), %v2028_v48 }
 0x175   : > { %v961_v18 = vsel %vm2113_vm3, 0, %v2112_v44  ;;  %vm982_vm3 = vweird.f32 %v2919_v50  ;;  %2027 = vst [vmem:[%s1946_s6 + $0xb0] sm:$0xff] (%p2324_p4), %v2026_v57 }
 0x176   : > { %v962_v56 = vsub.s32 32, %v961_v18  ;;  %v966_v39 = vsub.s32 4294967266, %v961_v18  ;;  %v963_v43 = vshll.u32 %v954_v60, %v961_v18  ;;  %v2014_v60 = vld [vmem:[%s2673_s30 + $0x28] sm:$0xff] (%p2324_p4) }
 0x177   : > { %2015 = vst [vmem:[%s1946_s6 + $0x50] sm:$0xff] (%p2324_p4), %v2014_v60 }
 0x178   : > { %v964_v34 = vshrl.u32 %v946_v52, %v962_v56  ;;  %v967_v3 = vadd.s32 127, %v966_v39 }
 0x17a   : > { %v965_v22 = vor.u32 %v964_v34, %v963_v43  ;;  %v968_v29 = vshll.u32 %v967_v3, 23 }
 0x17c   : > { %v969_v5 = vor.u32 4788187, %v968_v29  ;;  %v972_v1 = vcvt.s32.f32 %v965_v22 }
 0x17d   : > { %v2246_v42 = vpop.eup %2245 }
 0x17e   : > { %v2248_v49 = vpop.eup %2247  ;;  %v1094_v28 = vxor.u32 2147483648, %v2246_v42  ;;  %v970_v30 = vand.u32 2147483647, %v969_v5 }
 0x17f   : > { %v1091_v51 = vxor.u32 2147483648, %v2248_v49 }
 0x180   : > { %v1095_v20 = vsel %vm1093_vm6, %v1094_v28, %v2248_v49  ;;  %v1927_v40 = vsel %vm1925_vm15, %v1094_v28, %v2248_v49  ;;  %v973_v26 = vmul.f32 %v972_v1, %v970_v30 }
 0x181   : > { %v1092_v27 = vsel %vm1090_vm8, %v2246_v42, %v1091_v51  ;;  %v1924_v11 = vsel %vm1922_vm5, %v2246_v42, %v1091_v51 }
 0x182   : > { %v1096_v58 = vsel %vm1089_vm7, %v1092_v27, %v1095_v20  ;;  %v1928_v37 = vsel %vm1921_vm2, %v1924_v11, %v1927_v40  ;;  %v974_v21 = vxor.u32 2147483648, %v973_v26 }
 0x183   : > { %v1097_v0 = vsel %vm1086_vm4, nan, %v1096_v58  ;;  %v1929_v35 = vsel %vm1086_vm4, nan, %v1928_v37 }
 0x184   : > { %1105 = vst [vmem:[%s2673_s30 + $0x38] sm:$0xff] %v1097_v0  ;;  %1937 = vst [vmem:[%s2673_s30 + $0x78] sm:$0xff] %v1929_v35  ;;  %v975_v54 = vsel %vm892_vm9, %v974_v21, %v973_v26 }
 0x185   : > { %v978_v31 = vsel %vm891_vm10, %v2919_v50, %v975_v54  ;;  %v2004_v50 = vld [vmem:[%s2673_s30] sm:$0xff] (%p2324_p4) }
 0x186   : > { %2249 = vcosq.f32 %v978_v31  ;;  %2005 = vst [vmem:[%s1946_s6] sm:$0xff] (%p2324_p4), %v2004_v50 }
 0x187   : > { %2251 = vsinq.f32 %v978_v31 }
 0x18b   : > { %v2018_v13 = vld [vmem:[%s2673_s30 + $0x38] sm:$0xff] (%p2324_p4) }
 0x18c   : > { %2019 = vst [vmem:[%s1946_s6 + $0x70] sm:$0xff] (%p2324_p4), %v2018_v13  ;;  %v2034_v19 = vld [vmem:[%s2673_s30 + $0x78] sm:$0xff] (%p2324_p4) }
 0x18d   : > { %2035 = vst [vmem:[%s1946_s6 + $0xf0] sm:$0xff] (%p2324_p4), %v2034_v19 }
 0x190   : > { %v2250_v16 = vpop.eup %2249 }
 0x191   : > { %v2252_v17 = vpop.eup %2251  ;;  %v990_v6 = vxor.u32 2147483648, %v2250_v16  ;;  %1944 = sbr.rel (!%p2324_p4) target bundleno = 417 (0x1a1), region = 32 }
 0x192   : > { %v987_v15 = vxor.u32 2147483648, %v2252_v17 }
 0x193   : > { %v991_v25 = vsel %vm989_vm11, %v990_v6, %v2252_v17  ;;  %v1824_v47 = vsel %vm1822_vm12, %v990_v6, %v2252_v17 }
 0x194   : > { %v988_v8 = vsel %vm986_vm13, %v2250_v16, %v987_v15  ;;  %v1821_v53 = vsel %vm1819_vm14, %v2250_v16, %v987_v15 }
 0x195   : > { %v992_v32 = vsel %vm985_vm0, %v988_v8, %v991_v25  ;;  %v1825_v41 = vsel %vm1818_vm1, %v1821_v53, %v1824_v47 }
 0x196   : > { %v993_v4 = vsel %vm982_vm3, nan, %v992_v32  ;;  %v1826_v61 = vsel %vm982_vm3, nan, %v1825_v41 }
 0x197   : > { %1104 = vst [vmem:[%s2673_s30 + $0x30] sm:$0xff] %v993_v4  ;;  %1936 = vst [vmem:[%s2673_s30 + $0x70] sm:$0xff] %v1826_v61 }
 0x19e   : > { %v2016_v46 = vld [vmem:[%s2673_s30 + $0x30] sm:$0xff] }
 0x19f   : > { %2017 = vst [vmem:[%s1946_s6 + $0x60] sm:$0xff] %v2016_v46  ;;  %v2032_v44 = vld [vmem:[%s2673_s30 + $0x70] sm:$0xff] }
 0x1a0   : > { %2033 = vst [vmem:[%s1946_s6 + $0xe0] sm:$0xff] %v2032_v44 }
 0x1a1 PF: > { %p9_p7 = scmp.ge.s32.totalorder %s2314_s13, 4   ;;  %s3181_s9 = smov %s2271_s10 }
 0x1a2   : > { %s3182_s10 = smov %s2322_s16  ;;  %s3183_s11 = smov %s2314_s13 }
 0x1a3   :  { %11 = sbr.rel (!%p9_p7) target bundleno = 2 (0x2), region = 93 }

</bundles_post_ra>
